<compile_context>
chip_gen: v7x
topology: tpu7x:2x2x1
jax: 0.10.0
libtpu: 0.0.40
codegen_flags: <defaults>
</compile_context>

<pallas_src>
import functools

import jax
import jax.numpy as jnp
from jax import lax
from jax.experimental import pallas as pl
from jax.experimental.pallas import tpu as pltpu


def spanner_kernel(xi_ref, xj_ref, a_ref, c_ref, wd_ref, w2_ref, b2_ref, o_ref,
                   *, n_chunks):
    """One (batch, i-tile, j-tile) span tile per grid step.

    xi_ref : [1, ti, H]      bf16  encoder rows for the i-tile
    xj_ref : [1, tj, H]      bf16  encoder rows for the j-tile
    a_ref  : [1, ti, 4H]     bf16  x_i @ (W1a + W1c) + b1   (precomputed)
    c_ref  : [1, tj, 4H]     bf16  x_j @ (W1b - W1c)        (precomputed)
    wd_ref : [H, 4H]         bf16  W1d (the row*col quarter of W1)
    w2_ref : [4H, Lp]        bf16  second Linear weight, labels padded to Lp
    b2_ref : [1, Lp]         f32   second Linear bias, padded
    o_ref  : [1, ti, tj, Lp] bf16  span scores (padded label dim)
    """
    ti = xi_ref.shape[1]
    tj = xj_ref.shape[1]
    H = xi_ref.shape[2]
    H4 = wd_ref.shape[1]
    Lp = w2_ref.shape[1]
    ci = ti // n_chunks                      # i-rows per chunk (static)

    xj = xj_ref[0]                           # [tj, H]   bf16, reused by all chunks
    cj = c_ref[0]                            # [tj, 4H]  bf16
    wd = wd_ref[...]                         # [H, 4H]   bf16
    w2 = w2_ref[...]                         # [4H, Lp]  bf16
    b2 = b2_ref[...]                         # [1, Lp]   f32

    def chunk(k, carry):
        i0 = k * ci
        if ci % 8 == 0:
            i0 = pl.multiple_of(i0, 8)       # sublane-aligned dynamic slice
        xi_c = xi_ref[0, pl.ds(i0, ci), :]   # [ci, H]
        a_c = a_ref[0, pl.ds(i0, ci), :]     # [ci, 4H]

        # Only the elementwise-product quarter of the concat needs the
        # T^2-sized matmul; build its operand chunk-locally (never a full
        # [T*T, H] tensor).
        prod = (xi_c[:, None, :] * xj[None, :, :]).reshape(ci * tj, H)     # bf16
        h = jnp.dot(prod, wd, preferred_element_type=jnp.float32)          # f32
        # Broadcast adds stay chunk-sized (cj broadcasts over the leading dim,
        # a_c over sublanes) -- no full-tile f32 temporaries.
        h = h.reshape(ci, tj, H4) + cj[None, :, :] + a_c[:, None, :]
        # bf16 tanh: EUP bf16 path on v6e/v7x (still correct on v5e); its
        # result feeds the bf16 second matmul anyway.
        h16 = jnp.tanh(h.astype(jnp.bfloat16))
        y = jnp.dot(h16.reshape(ci * tj, H4), w2,
                    preferred_element_type=jnp.float32) + b2
        o_ref[0, pl.ds(i0, ci), :, :] = y.reshape(ci, tj, Lp).astype(o_ref.dtype)
        return carry

    lax.fori_loop(0, n_chunks, chunk, 0, unroll=True)


def _round_up(n, m):
    return ((n + m - 1) // m) * m


def _num_row_chunks(ti, tj, target_rows=256):
    """Number of i-row chunks so each chunk covers ~target_rows span cells."""
    ci = max(1, min(ti, target_rows // max(tj, 1)))
    while ti % ci:
        ci -= 1
    return ti // ci


def _vmem_limit_bytes():
    """Scoped-VMEM budget: ~85% of physical, capped at 100 MiB (v5e/v6e 128 MiB,
    v7x 64 MiB)."""
    try:
        cap = int(pltpu.get_tpu_info().vmem_capacity_bytes)
    except Exception:
        cap = 64 * 1024 * 1024               # conservative (v7x-sized) fallback
    return min(int(cap * 0.85), 100 * 1024 * 1024)


def spanner_head(share_encoder, w1, b1, w2, b2, *, tile_cap=32):
    """share_encoder: [B, T, H] -> span scores [B, T, T, L] (f32).

    w1: [4H, 4H], b1: [1, 4H], w2: [4H, L], b2: [1, L]   (in, out layout).
    """
    B, T, H = share_encoder.shape
    H4 = 4 * H
    L = w2.shape[1]
    assert tile_cap % 8 == 0
    assert w1.shape == (H4, H4) and b1.shape == (1, H4)
    assert w2.shape == (H4, L) and b2.shape == (1, L)

    # Span-table tile (second-minor dims 8-aligned); pad T to a tile multiple
    # so odd sequence lengths never force a full-axis (VMEM-blowing) tile.
    ti = tj = min(tile_cap, _round_up(T, 8))
    Tp = _round_up(T, ti)
    # Lane-dense / full-MXU-width label dim for the second matmul + store.
    Lp = _round_up(max(L, 128), 128)
    n_chunks = _num_row_chunks(ti, tj)

    # ---- wrapper-side algebra: fold the concat matmul --------------------
    #   concat(r, c, r-c, r*c) @ W1 = r@(W1a+W1c) + c@(W1b-W1c) + (r*c)@W1d
    w1f = w1.astype(jnp.float32)
    wa = (w1f[0 * H:1 * H] + w1f[2 * H:3 * H]).astype(jnp.bfloat16)   # [H, 4H]
    wb = (w1f[1 * H:2 * H] - w1f[2 * H:3 * H]).astype(jnp.bfloat16)   # [H, 4H]
    wd = (w1f[3 * H:4 * H]).astype(jnp.bfloat16)                      # [H, 4H]

    x_bf = share_encoder.astype(jnp.bfloat16)
    if Tp != T:
        x_bf = jnp.pad(x_bf, ((0, 0), (0, Tp - T), (0, 0)))

    # A/C precompute: once per token (O(T*H*4H)), bf16 MXU with f32 acc.
    a = jnp.einsum("bth,hk->btk", x_bf, wa,
                   preferred_element_type=jnp.float32) + b1.astype(jnp.float32)
    c = jnp.einsum("bth,hk->btk", x_bf, wb,
                   preferred_element_type=jnp.float32)
    a_bf = a.astype(jnp.bfloat16)            # b1 folded in; bf16 halves the DMA
    c_bf = c.astype(jnp.bfloat16)

    w2p = jnp.pad(w2.astype(jnp.bfloat16), ((0, 0), (0, Lp - L)))
    b2p = jnp.pad(b2.astype(jnp.float32), ((0, 0), (0, Lp - L)))

    gi, gj = Tp // ti, Tp // tj
    flops = 2 * B * Tp * Tp * (H * H4 + H4 * Lp) + 4 * B * Tp * Tp * H4
    bytes_accessed = (
        2 * B * Tp * H * (gj + gi)           # xi / xj tiles (bf16)
        + 2 * B * Tp * H4 * (gj + gi)        # A / C tiles (bf16)
        + 2 * (H * H4 + H4 * Lp) + 4 * Lp    # resident weights + bias
        + 2 * B * Tp * Tp * Lp               # bf16 output
    )
    cost = pl.CostEstimate(flops=flops,
                           transcendentals=B * Tp * Tp * H4,
                           bytes_accessed=bytes_accessed)

    kernel = functools.partial(spanner_kernel, n_chunks=n_chunks)

    def build(single_buffer_weights):
        def const_spec(shape):
            if single_buffer_weights:
                return pl.BlockSpec(shape, lambda b, i, j: (0,) * len(shape),
                                    pipeline_mode=pl.Buffered(1))
            return pl.BlockSpec(shape, lambda b, i, j: (0,) * len(shape))

        return pl.pallas_call(
            kernel,
            out_shape=jax.ShapeDtypeStruct((B, Tp, Tp, Lp), jnp.bfloat16),
            grid_spec=pltpu.PrefetchScalarGridSpec(
                num_scalar_prefetch=0,
                grid=(B, gi, gj),
                in_specs=[
                    pl.BlockSpec((1, ti, H), lambda b, i, j: (b, i, 0)),   # x rows
                    pl.BlockSpec((1, tj, H), lambda b, i, j: (b, j, 0)),   # x cols
                    pl.BlockSpec((1, ti, H4), lambda b, i, j: (b, i, 0)),  # A (+b1)
                    pl.BlockSpec((1, tj, H4), lambda b, i, j: (b, j, 0)),  # C
                    const_spec((H, H4)),                                   # W1d
                    const_spec((H4, Lp)),                                  # W2
                    const_spec((1, Lp)),                                   # b2
                ],
                out_specs=pl.BlockSpec((1, ti, tj, Lp),
                                       lambda b, i, j: (b, i, j, 0)),
            ),
            compiler_params=pltpu.CompilerParams(
                dimension_semantics=("parallel", "parallel", "parallel"),
                vmem_limit_bytes=_vmem_limit_bytes(),
            ),
            cost_estimate=cost,
        )

    args = (x_bf, x_bf, a_bf, c_bf, wd, w2p, b2p)
    try:
        out = build(True)(*args)
    except Exception:
        # Fallback for JAX/Mosaic builds that reject single-buffered specs.
        out = build(False)(*args)

    # Drop T / label padding; return f32 scores like the PyTorch head.
    return out[:, :T, :T, :L].astype(jnp.float32)


def spanner_head_ref(share_encoder, w1, b1, w2, b2):
    """Pure-JAX f32 reference mirroring the PyTorch forward (eval mode)."""
    x = share_encoder.astype(jnp.float32)
    B, T, H = x.shape
    ext_row = jnp.broadcast_to(x[:, :, None, :], (B, T, T, H))
    ext_col = jnp.broadcast_to(x[:, None, :, :], (B, T, T, H))
    table = jnp.concatenate(
        [ext_row, ext_col, ext_row - ext_col, ext_row * ext_col], axis=-1
    )                                                   # [B, T, T, 4H]
    h = jnp.tanh(table @ w1 + b1[0])
    return h @ w2 + b2[0]


if __name__ == "__main__":
    def make_inputs(key, B, T, H, L):
        H4 = 4 * H
        k_x, k_w1, k_b1, k_w2, k_b2 = jax.random.split(key, 5)
        x = jax.random.normal(k_x, (B, T, H), dtype=jnp.float32)
        w1 = jax.random.normal(k_w1, (H4, H4), dtype=jnp.float32) / jnp.sqrt(H4)
        b1 = jax.random.normal(k_b1, (1, H4), dtype=jnp.float32) * 0.01
        w2 = jax.random.normal(k_w2, (H4, L), dtype=jnp.float32) / jnp.sqrt(H4)
        b2 = jax.random.normal(k_b2, (1, L), dtype=jnp.float32) * 0.01
        return x, w1, b1, w2, b2

    # Primary small config consistent with the module
    # (hidden_size=32 -> classifier_hidden=128, num_labels=8).
    B, T, H, L = 2, 8, 32, 8
    x, w1, b1, w2, b2 = make_inputs(jax.random.PRNGKey(0), B, T, H, L)
    out = jax.block_until_ready(spanner_head(x, w1, b1, w2, b2))
    ref = spanner_head_ref(x, w1, b1, w2, b2)
    assert out.shape == (B, T, T, L), out.shape
    # Tolerance reflects the bf16 operand / bf16-tanh / bf16-output datapath
    # with f32 accumulation.
    assert jnp.allclose(out, ref, atol=8e-2, rtol=5e-2), (
        float(jnp.max(jnp.abs(out - ref))))

    # Secondary config exercising span-tile tiling, in-kernel row chunking and
    # the T-padding path (T=40 -> padded to 64, tile 32, 4 row chunks).
    B2, T2 = 1, 40
    x2, w1b, b1b, w2b, b2b = make_inputs(jax.random.PRNGKey(1), B2, T2, H, L)
    out2 = jax.block_until_ready(spanner_head(x2, w1b, b1b, w2b, b2b))
    ref2 = spanner_head_ref(x2, w1b, b1b, w2b, b2b)
    assert out2.shape == (B2, T2, T2, L), out2.shape
    assert jnp.allclose(out2, ref2, atol=8e-2, rtol=5e-2), (
        float(jnp.max(jnp.abs(out2 - ref2))))

    print("KERNEL_OK")
</pallas_src>

<mosaic_0001>
module attributes {stable_mosaic.version = 11 : i64} {
  func.func @spanner_kernel(%arg0: i32, %arg1: i32, %arg2: i32, %arg3: memref<1x8x32xbf16, #tpu.memory_space<vmem>>, %arg4: memref<1x8x32xbf16, #tpu.memory_space<vmem>>, %arg5: memref<1x8x128xbf16, #tpu.memory_space<vmem>>, %arg6: memref<1x8x128xbf16, #tpu.memory_space<vmem>>, %arg7: memref<32x128xbf16, #tpu.memory_space<vmem>>, %arg8: memref<128x128xbf16, #tpu.memory_space<vmem>>, %arg9: memref<1x128xf32, #tpu.memory_space<vmem>>, %arg10: memref<1x8x8x128xbf16, #tpu.memory_space<vmem>>) attributes {dimension_semantics = [#tpu.dimension_semantics<parallel>, #tpu.dimension_semantics<parallel>, #tpu.dimension_semantics<parallel>], iteration_bounds = array<i64: 2, 1, 1>, scalar_prefetch = 0 : i64, scratch_operands = 0 : i64, tpu.core_type = #tpu.core_type<tc>, window_params = [{transform_indices = @transform_0, window_bounds = array<i64: 1, 8, 32>}, {transform_indices = @transform_1, window_bounds = array<i64: 1, 8, 32>}, {transform_indices = @transform_2, window_bounds = array<i64: 1, 8, 128>}, {transform_indices = @transform_3, window_bounds = array<i64: 1, 8, 128>}, {pipeline_mode = #tpu.pipeline_mode<synchronous>, transform_indices = @transform_4, window_bounds = array<i64: 32, 128>}, {pipeline_mode = #tpu.pipeline_mode<synchronous>, transform_indices = @transform_5, window_bounds = array<i64: 128, 128>}, {pipeline_mode = #tpu.pipeline_mode<synchronous>, transform_indices = @transform_6, window_bounds = array<i64: 1, 128>}, {transform_indices = @transform_7, window_bounds = array<i64: 1, 8, 8, 128>}]} {
    %c0 = arith.constant 0 : index
    %c0_0 = arith.constant 0 : index
    %c0_1 = arith.constant 0 : index
    %0 = vector.load %arg4[%c0, %c0_0, %c0_1] : memref<1x8x32xbf16, #tpu.memory_space<vmem>>, vector<1x8x32xbf16>
    %1 = vector.shape_cast %0 : vector<1x8x32xbf16> to vector<8x32xbf16>
    %c0_2 = arith.constant 0 : index
    %c0_3 = arith.constant 0 : index
    %c0_4 = arith.constant 0 : index
    %2 = vector.load %arg6[%c0_2, %c0_3, %c0_4] : memref<1x8x128xbf16, #tpu.memory_space<vmem>>, vector<1x8x128xbf16>
    %3 = vector.shape_cast %2 : vector<1x8x128xbf16> to vector<8x128xbf16>
    %c0_5 = arith.constant 0 : index
    %c0_6 = arith.constant 0 : index
    %4 = vector.load %arg7[%c0_5, %c0_6] : memref<32x128xbf16, #tpu.memory_space<vmem>>, vector<32x128xbf16>
    %c0_7 = arith.constant 0 : index
    %c0_8 = arith.constant 0 : index
    %5 = vector.load %arg8[%c0_7, %c0_8] : memref<128x128xbf16, #tpu.memory_space<vmem>>, vector<128x128xbf16>
    %c0_9 = arith.constant 0 : index
    %c0_10 = arith.constant 0 : index
    %6 = vector.load %arg9[%c0_9, %c0_10] : memref<1x128xf32, #tpu.memory_space<vmem>>, vector<1x128xf32>
    %c0_i32 = arith.constant 0 : i32
    %c8_i32 = arith.constant 8 : i32
    %7 = arith.muli %c0_i32, %c8_i32 : i32
    %8 = tpu.assume_multiple %7, 8 : i32
    %c0_11 = arith.constant 0 : index
    %9 = arith.index_cast %8 : i32 to index
    %c0_12 = arith.constant 0 : index
    %10 = vector.load %arg3[%c0_11, %9, %c0_12] : memref<1x8x32xbf16, #tpu.memory_space<vmem>>, vector<1x8x32xbf16>
    %11 = vector.shape_cast %10 : vector<1x8x32xbf16> to vector<8x32xbf16>
    %c0_13 = arith.constant 0 : index
    %12 = arith.index_cast %8 : i32 to index
    %c0_14 = arith.constant 0 : index
    %13 = vector.load %arg5[%c0_13, %12, %c0_14] : memref<1x8x128xbf16, #tpu.memory_space<vmem>>, vector<1x8x128xbf16>
    %14 = vector.shape_cast %13 : vector<1x8x128xbf16> to vector<8x128xbf16>
    %15 = vector.shape_cast %11 : vector<8x32xbf16> to vector<8x1x32xbf16>
    %16 = vector.shape_cast %1 : vector<8x32xbf16> to vector<1x8x32xbf16>
    %17 = vector.broadcast %15 : vector<8x1x32xbf16> to vector<8x8x32xbf16>
    %18 = vector.broadcast %16 : vector<1x8x32xbf16> to vector<8x8x32xbf16>
    %19 = arith.mulf %17, %18 : vector<8x8x32xbf16>
    %20 = vector.shape_cast %19 : vector<8x8x32xbf16> to vector<64x32xbf16>
    %cst = arith.constant dense<0.000000e+00> : vector<64x128xf32>
    %21 = tpu.matmul %20, %4, %cst {dimension_numbers = #tpu.dot_dimension_numbers<[1], [0], [0], [1], [0, 0, 1, 1], [], []>} : vector<64x32xbf16>, vector<32x128xbf16>, vector<64x128xf32> -> vector<64x128xf32>
    %22 = vector.shape_cast %21 : vector<64x128xf32> to vector<8x8x128xf32>
    %23 = vector.shape_cast %3 : vector<8x128xbf16> to vector<1x8x128xbf16>
    %24 = arith.extf %23 : vector<1x8x128xbf16> to vector<1x8x128xf32>
    %25 = vector.broadcast %24 : vector<1x8x128xf32> to vector<8x8x128xf32>
    %26 = arith.addf %22, %25 : vector<8x8x128xf32>
    %27 = vector.shape_cast %14 : vector<8x128xbf16> to vector<8x1x128xbf16>
    %28 = arith.extf %27 : vector<8x1x128xbf16> to vector<8x1x128xf32>
    %29 = vector.broadcast %28 : vector<8x1x128xf32> to vector<8x8x128xf32>
    %30 = arith.addf %26, %29 : vector<8x8x128xf32>
    %31 = arith.truncf %30 : vector<8x8x128xf32> to vector<8x8x128xbf16>
    %32 = math.tanh %31 : vector<8x8x128xbf16>
    %33 = vector.shape_cast %32 : vector<8x8x128xbf16> to vector<64x128xbf16>
    %cst_15 = arith.constant dense<0.000000e+00> : vector<64x128xf32>
    %34 = tpu.matmul %33, %5, %cst_15 {dimension_numbers = #tpu.dot_dimension_numbers<[1], [0], [0], [1], [0, 0, 1, 1], [], []>} : vector<64x128xbf16>, vector<128x128xbf16>, vector<64x128xf32> -> vector<64x128xf32>
    %35 = vector.broadcast %6 : vector<1x128xf32> to vector<64x128xf32>
    %36 = arith.addf %34, %35 : vector<64x128xf32>
    %37 = vector.shape_cast %36 : vector<64x128xf32> to vector<8x8x128xf32>
    %38 = arith.truncf %37 : vector<8x8x128xf32> to vector<8x8x128xbf16>
    %c0_16 = arith.constant 0 : index
    %39 = arith.index_cast %8 : i32 to index
    %c0_17 = arith.constant 0 : index
    %c0_18 = arith.constant 0 : index
    %40 = vector.load %arg10[%c0_16, %39, %c0_17, %c0_18] : memref<1x8x8x128xbf16, #tpu.memory_space<vmem>>, vector<1x8x8x128xbf16>
    %41 = vector.shape_cast %40 : vector<1x8x8x128xbf16> to vector<8x8x128xbf16>
    %42 = vector.shape_cast %38 : vector<8x8x128xbf16> to vector<1x8x8x128xbf16>
    tpu.vector_store %arg10[%c0_16, %39, %c0_17, %c0_18], %42 {strides = array<i32>} : memref<1x8x8x128xbf16, #tpu.memory_space<vmem>>, vector<1x8x8x128xbf16>,
    %c1_i32 = arith.constant 1 : i32
    return
  }
  func.func @transform_0(%arg0: i32, %arg1: i32, %arg2: i32) -> (i32, i32, i32) {
    %c0_i32 = arith.constant 0 : i32
    %c0_i32_0 = arith.constant 0 : i32
    return %arg0, %arg1, %c0_i32 : i32, i32, i32
  }
  func.func @transform_1(%arg0: i32, %arg1: i32, %arg2: i32) -> (i32, i32, i32) {
    %c0_i32 = arith.constant 0 : i32
    %c0_i32_0 = arith.constant 0 : i32
    return %arg0, %arg2, %c0_i32 : i32, i32, i32
  }
  func.func @transform_2(%arg0: i32, %arg1: i32, %arg2: i32) -> (i32, i32, i32) {
    %c0_i32 = arith.constant 0 : i32
    %c0_i32_0 = arith.constant 0 : i32
    return %arg0, %arg1, %c0_i32 : i32, i32, i32
  }
  func.func @transform_3(%arg0: i32, %arg1: i32, %arg2: i32) -> (i32, i32, i32) {
    %c0_i32 = arith.constant 0 : i32
    %c0_i32_0 = arith.constant 0 : i32
    return %arg0, %arg2, %c0_i32 : i32, i32, i32
  }
  func.func @transform_4(%arg0: i32, %arg1: i32, %arg2: i32) -> (i32, i32) {
    %c0_i32 = arith.constant 0 : i32
    %c0_i32_0 = arith.constant 0 : i32
    %c0_i32_1 = arith.constant 0 : i32
    return %c0_i32, %c0_i32_0 : i32, i32
  }
  func.func @transform_5(%arg0: i32, %arg1: i32, %arg2: i32) -> (i32, i32) {
    %c0_i32 = arith.constant 0 : i32
    %c0_i32_0 = arith.constant 0 : i32
    %c0_i32_1 = arith.constant 0 : i32
    return %c0_i32, %c0_i32_0 : i32, i32
  }
  func.func @transform_6(%arg0: i32, %arg1: i32, %arg2: i32) -> (i32, i32) {
    %c0_i32 = arith.constant 0 : i32
    %c0_i32_0 = arith.constant 0 : i32
    %c0_i32_1 = arith.constant 0 : i32
    return %c0_i32, %c0_i32_0 : i32, i32
  }
  func.func @transform_7(%arg0: i32, %arg1: i32, %arg2: i32) -> (i32, i32, i32, i32) {
    %c0_i32 = arith.constant 0 : i32
    %c0_i32_0 = arith.constant 0 : i32
    return %arg0, %arg1, %arg2, %c0_i32 : i32, i32, i32, i32
  }
}

module attributes {stable_mosaic.version = 11 : i64} {
  func.func @spanner_kernel(%arg0: i32, %arg1: i32, %arg2: i32, %arg3: memref<1x8x32xbf16, #tpu.memory_space<vmem>>, %arg4: memref<1x8x32xbf16, #tpu.memory_space<vmem>>, %arg5: memref<1x8x128xbf16, #tpu.memory_space<vmem>>, %arg6: memref<1x8x128xbf16, #tpu.memory_space<vmem>>, %arg7: memref<32x128xbf16, #tpu.memory_space<vmem>>, %arg8: memref<128x128xbf16, #tpu.memory_space<vmem>>, %arg9: memref<1x128xf32, #tpu.memory_space<vmem>>, %arg10: memref<1x8x8x128xbf16, #tpu.memory_space<vmem>>) attributes {dimension_semantics = [#tpu.dimension_semantics<parallel>, #tpu.dimension_semantics<parallel>, #tpu.dimension_semantics<parallel>], iteration_bounds = array<i64: 2, 1, 1>, scalar_prefetch = 0 : i64, scratch_operands = 0 : i64, tpu.core_type = #tpu.core_type<tc>, window_params = [{transform_indices = @transform_0, window_bounds = array<i64: 1, 8, 32>}, {transform_indices = @transform_1, window_bounds = array<i64: 1, 8, 32>}, {transform_indices = @transform_2, window_bounds = array<i64: 1, 8, 128>}, {transform_indices = @transform_3, window_bounds = array<i64: 1, 8, 128>}, {pipeline_mode = #tpu.pipeline_mode<synchronous>, transform_indices = @transform_4, window_bounds = array<i64: 32, 128>}, {pipeline_mode = #tpu.pipeline_mode<synchronous>, transform_indices = @transform_5, window_bounds = array<i64: 128, 128>}, {pipeline_mode = #tpu.pipeline_mode<synchronous>, transform_indices = @transform_6, window_bounds = array<i64: 1, 128>}, {transform_indices = @transform_7, window_bounds = array<i64: 1, 8, 8, 128>}]} {
    %c0 = arith.constant 0 : index
    %c0_0 = arith.constant 0 : index
    %c0_1 = arith.constant 0 : index
    %0 = vector.load %arg4[%c0, %c0_0, %c0_1] : memref<1x8x32xbf16, #tpu.memory_space<vmem>>, vector<1x8x32xbf16>
    %1 = vector.shape_cast %0 : vector<1x8x32xbf16> to vector<8x32xbf16>
    %c0_2 = arith.constant 0 : index
    %c0_3 = arith.constant 0 : index
    %c0_4 = arith.constant 0 : index
    %2 = vector.load %arg6[%c0_2, %c0_3, %c0_4] : memref<1x8x128xbf16, #tpu.memory_space<vmem>>, vector<1x8x128xbf16>
    %3 = vector.shape_cast %2 : vector<1x8x128xbf16> to vector<8x128xbf16>
    %c0_5 = arith.constant 0 : index
    %c0_6 = arith.constant 0 : index
    %4 = vector.load %arg7[%c0_5, %c0_6] : memref<32x128xbf16, #tpu.memory_space<vmem>>, vector<32x128xbf16>
    %c0_7 = arith.constant 0 : index
    %c0_8 = arith.constant 0 : index
    %5 = vector.load %arg8[%c0_7, %c0_8] : memref<128x128xbf16, #tpu.memory_space<vmem>>, vector<128x128xbf16>
    %c0_9 = arith.constant 0 : index
    %c0_10 = arith.constant 0 : index
    %6 = vector.load %arg9[%c0_9, %c0_10] : memref<1x128xf32, #tpu.memory_space<vmem>>, vector<1x128xf32>
    %c0_i32 = arith.constant 0 : i32
    %c8_i32 = arith.constant 8 : i32
    %7 = arith.muli %c0_i32, %c8_i32 : i32
    %8 = tpu.assume_multiple %7, 8 : i32
    %c0_11 = arith.constant 0 : index
    %9 = arith.index_cast %8 : i32 to index
    %c0_12 = arith.constant 0 : index
    %10 = vector.load %arg3[%c0_11, %9, %c0_12] : memref<1x8x32xbf16, #tpu.memory_space<vmem>>, vector<1x8x32xbf16>
    %11 = vector.shape_cast %10 : vector<1x8x32xbf16> to vector<8x32xbf16>
    %c0_13 = arith.constant 0 : index
    %12 = arith.index_cast %8 : i32 to index
    %c0_14 = arith.constant 0 : index
    %13 = vector.load %arg5[%c0_13, %12, %c0_14] : memref<1x8x128xbf16, #tpu.memory_space<vmem>>, vector<1x8x128xbf16>
    %14 = vector.shape_cast %13 : vector<1x8x128xbf16> to vector<8x128xbf16>
    %15 = vector.shape_cast %11 : vector<8x32xbf16> to vector<8x1x32xbf16>
    %16 = vector.shape_cast %1 : vector<8x32xbf16> to vector<1x8x32xbf16>
    %17 = vector.broadcast %15 : vector<8x1x32xbf16> to vector<8x8x32xbf16>
    %18 = vector.broadcast %16 : vector<1x8x32xbf16> to vector<8x8x32xbf16>
    %19 = arith.mulf %17, %18 : vector<8x8x32xbf16>
    %20 = vector.shape_cast %19 : vector<8x8x32xbf16> to vector<64x32xbf16>
    %cst = arith.constant dense<0.000000e+00> : vector<64x128xf32>
    %21 = tpu.matmul %20, %4, %cst {dimension_numbers = #tpu.dot_dimension_numbers<[1], [0], [0], [1], [0, 0, 1, 1], [], []>} : vector<64x32xbf16>, vector<32x128xbf16>, vector<64x128xf32> -> vector<64x128xf32>
    %22 = vector.shape_cast %21 : vector<64x128xf32> to vector<8x8x128xf32>
    %23 = vector.shape_cast %3 : vector<8x128xbf16> to vector<1x8x128xbf16>
    %24 = arith.extf %23 : vector<1x8x128xbf16> to vector<1x8x128xf32>
    %25 = vector.broadcast %24 : vector<1x8x128xf32> to vector<8x8x128xf32>
    %26 = arith.addf %22, %25 : vector<8x8x128xf32>
    %27 = vector.shape_cast %14 : vector<8x128xbf16> to vector<8x1x128xbf16>
    %28 = arith.extf %27 : vector<8x1x128xbf16> to vector<8x1x128xf32>
    %29 = vector.broadcast %28 : vector<8x1x128xf32> to vector<8x8x128xf32>
    %30 = arith.addf %26, %29 : vector<8x8x128xf32>
    %31 = arith.truncf %30 : vector<8x8x128xf32> to vector<8x8x128xbf16>
    %32 = math.tanh %31 : vector<8x8x128xbf16>
    %33 = vector.shape_cast %32 : vector<8x8x128xbf16> to vector<64x128xbf16>
    %cst_15 = arith.constant dense<0.000000e+00> : vector<64x128xf32>
    %34 = tpu.matmul %33, %5, %cst_15 {dimension_numbers = #tpu.dot_dimension_numbers<[1], [0], [0], [1], [0, 0, 1, 1], [], []>} : vector<64x128xbf16>, vector<128x128xbf16>, vector<64x128xf32> -> vector<64x128xf32>
    %35 = vector.broadcast %6 : vector<1x128xf32> to vector<64x128xf32>
    %36 = arith.addf %34, %35 : vector<64x128xf32>
    %37 = vector.shape_cast %36 : vector<64x128xf32> to vector<8x8x128xf32>
    %38 = arith.truncf %37 : vector<8x8x128xf32> to vector<8x8x128xbf16>
    %c0_16 = arith.constant 0 : index
    %39 = arith.index_cast %8 : i32 to index
    %c0_17 = arith.constant 0 : index
    %c0_18 = arith.constant 0 : index
    %40 = vector.load %arg10[%c0_16, %39, %c0_17, %c0_18] : memref<1x8x8x128xbf16, #tpu.memory_space<vmem>>, vector<1x8x8x128xbf16>
    %41 = vector.shape_cast %40 : vector<1x8x8x128xbf16> to vector<8x8x128xbf16>
    %42 = vector.shape_cast %38 : vector<8x8x128xbf16> to vector<1x8x8x128xbf16>
    tpu.vector_store %arg10[%c0_16, %39, %c0_17, %c0_18], %42 {strides = array<i32>} : memref<1x8x8x128xbf16, #tpu.memory_space<vmem>>, vector<1x8x8x128xbf16>,
    %c1_i32 = arith.constant 1 : i32
    return
  }
  func.func @transform_0(%arg0: i32, %arg1: i32, %arg2: i32) -> (i32, i32, i32) {
    %c0_i32 = arith.constant 0 : i32
    %c0_i32_0 = arith.constant 0 : i32
    return %arg0, %arg1, %c0_i32 : i32, i32, i32
  }
  func.func @transform_1(%arg0: i32, %arg1: i32, %arg2: i32) -> (i32, i32, i32) {
    %c0_i32 = arith.constant 0 : i32
    %c0_i32_0 = arith.constant 0 : i32
    return %arg0, %arg2, %c0_i32 : i32, i32, i32
  }
  func.func @transform_2(%arg0: i32, %arg1: i32, %arg2: i32) -> (i32, i32, i32) {
    %c0_i32 = arith.constant 0 : i32
    %c0_i32_0 = arith.constant 0 : i32
    return %arg0, %arg1, %c0_i32 : i32, i32, i32
  }
  func.func @transform_3(%arg0: i32, %arg1: i32, %arg2: i32) -> (i32, i32, i32) {
    %c0_i32 = arith.constant 0 : i32
    %c0_i32_0 = arith.constant 0 : i32
    return %arg0, %arg2, %c0_i32 : i32, i32, i32
  }
  func.func @transform_4(%arg0: i32, %arg1: i32, %arg2: i32) -> (i32, i32) {
    %c0_i32 = arith.constant 0 : i32
    %c0_i32_0 = arith.constant 0 : i32
    %c0_i32_1 = arith.constant 0 : i32
    return %c0_i32, %c0_i32_0 : i32, i32
  }
  func.func @transform_5(%arg0: i32, %arg1: i32, %arg2: i32) -> (i32, i32) {
    %c0_i32 = arith.constant 0 : i32
    %c0_i32_0 = arith.constant 0 : i32
    %c0_i32_1 = arith.constant 0 : i32
    return %c0_i32, %c0_i32_0 : i32, i32
  }
  func.func @transform_6(%arg0: i32, %arg1: i32, %arg2: i32) -> (i32, i32) {
    %c0_i32 = arith.constant 0 : i32
    %c0_i32_0 = arith.constant 0 : i32
    %c0_i32_1 = arith.constant 0 : i32
    return %c0_i32, %c0_i32_0 : i32, i32
  }
  func.func @transform_7(%arg0: i32, %arg1: i32, %arg2: i32) -> (i32, i32, i32, i32) {
    %c0_i32 = arith.constant 0 : i32
    %c0_i32_0 = arith.constant 0 : i32
    return %arg0, %arg1, %arg2, %c0_i32 : i32, i32, i32, i32
  }
}

</mosaic_0001>

<bundles_post_ra>
// kernel: tpu_custom_call.1
= control target key start
LH: loop header
LB: loop body
LE: loop exit
PB: predicated region body
PF: predicated region fallthrough
CT: control target
= control target key end

     0   :  { %s2177_s0 = inlined_call_operand.hbm [shape: bf16[2,8,32], index: 0, kind: input, shape index: {}]   ;;  %s2178_s1 = inlined_call_operand.hbm [shape: bf16[2,8,32], index: 1, kind: input, shape index: {}]   ;;  %s2179_s2 = inlined_call_operand.hbm [shape: bf16[2,8,128], index: 2, kind: input, shape index: {}]   ;;  %s2180_s3 = inlined_call_operand.vmem [shape: bf16[2,8,128], index: 3, kind: input, shape index: {}]   ;;  %s2181_s4 = inlined_call_operand.hbm [shape: bf16[32,128], index: 4, kind: input, shape index: {}]   ;;  %s2182_s5 = inlined_call_operand.hbm [shape: bf16[128,128], index: 5, kind: input, shape index: {}]   ;;  %s2183_s6 = inlined_call_operand.vmem [shape: f32[1,128], index: 6, kind: input, shape index: {}]   ;;  %s2184_s7 = inlined_call_operand.hbm [shape: bf16[2,8,8,128], index: 7, kind: output, shape index: {}]  }
   0x1   :  { %2204 = sst [smem:[#allocation21_spill]] %s2178_s1 }
   0x2   :  { %2205 = sst [smem:[#allocation22_spill]] %s2181_s4 }
   0x3   :  { %2206 = sst [smem:[#allocation23_spill]] %s2182_s5 }
   0x4   :  { %12 = vsyncpa [#allocation3], 0 }
   0x5   :  { %14 = vsyncpa [#allocation3 + $0x1], 0 }
   0x6   :  { %15 = vsyncpa [#allocation6], 0 }
   0x7   :  { %17 = vsyncpa [#allocation6 + $0x1], 0 }
   0x8   :  { %18 = vsyncpa [#allocation9], 0 }
   0x9   :  { %19 = vsyncpa [#allocation4], 0 }
   0xa   :  { %21 = vsyncpa [#allocation4 + $0x1], 0  ;;  %s1801_s24 = smov 0   ;;  %s1803_s25 = smov 0  }
   0xb   :  { %s1805_s26 = smov 0   ;;  %s1807_s27 = smov 0  }
   0xc   :  { %s1809_s28 = smov 0   ;;  %s1811_s29 = smov 0  }
   0xd LB: > { %2207 = sst [smem:[#allocation16_spill]] %s1743_s28  ;;  %s1832_s30 = sadd.s32 4294967295, %s1747_s29   ;;  %s1747_s29 = sphi %s1811_s29, %s27_s29   ;;  %s1743_s28 = sphi %s1809_s28, %s2243_s28   ;;  %s1739_s27 = sphi %s1807_s27, %s2242_s27   ;;  %s1735_s26 = sphi %s1805_s26, %s2246_s26   ;;  %s1731_s25 = sphi %s1803_s25, %s2245_s25   ;;  %s1727_s24 = sphi %s1801_s24, %s2244_s24  }
   0xe   : > { %2208 = sst [smem:[#allocation17_spill]] %s1747_s29  ;;  %s1251_s8 = sadd.s32 4294967294, %s1747_s29  }
   0xf   : > { %p68_p0 = scmp.ne.s32.totalorder %s1731_s25, %s1727_s24  ;;  %p2185_p1 = scmp.eq.s32.totalorder %s1832_s30, 0 }
  0x10   : > { %p249_p3 = scmp.eq.s32.totalorder %s1251_s8, 1  ;;  %p1252_p5 = scmp.ge.s32.totalorder %s1747_s29, 1 }
  0x11   : > { %p1841_p4 = por %p2185_p1, %p68_p0  ;;  %p256_p7 = scmp.lt.s32.totalorder %s1747_s29, 3 }
  0x12   : > { %p1846_p6 = por %p249_p3, %p68_p0  ;;  %s1749_s12 = smov [#allocation8]  }
  0x13   : > { %s2209_s9 = scalar_select %p1841_p4, 1, 0 }
  0x14   : > { %s2210_s10 = scalar_select %p1846_p6, 1, 0 }
  0x15   : > { %p1851_p8 = pnand %p1252_p5, %p256_p7  ;;  %s268_s13 = sshll.u32 %s1749_s12, 4  ;;  %s269_s13 = int_to_ptr.vmem [resolvable:$true] %s268_s13 }
  0x16   : > { %2211 = sst [smem:[#allocation18_spill]] %s2210_s10  ;;  %s46_s15 = sadd.s32 1, %s1743_s28 }
  0x17   : > { %s2212_s11 = scalar_select %p1851_p8, 1, 0 }
  0x18   : > { %p1402_p9 = pneg %p1851_p8  ;;  %s2214_s4 = sld [smem:[#allocation22_spill]] }
  0x1a   : > { %p1860_p11 = pnand %p1402_p9, %p2185_p1 }
  0x1c   : > { %s2213_s14 = scalar_select %p1860_p11, 1, 0 }
  0x1d   : > { %p2196_p13 = pneg %p1860_p11 }
  0x1e   : > { %s1511_s18 = scalar_lea.hbm %s2214_s4, 256 }
  0x1f   : > { %p1512_p12 = scmp.ne.s32.totalorder %s2214_s4, %s1511_s18  ;;  %p1518_p5 = scmp.lt.u32.totalorder %s1511_s18, %s2214_s4 }
  0x21   : > { %p1514_p0 = pnand %p2196_p13, %p1512_p12 }
  0x23   : > { %p1515_p3 = pneg %p1514_p0 }
  0x25   : > { %p1520_p7 = pnand %p1518_p5, %p1515_p3 }
  0x27   : > { %1523 = shalt.err (!%p1520_p7)
}
  0x28   : > { %s1524_s23 = scalar_lea.vmem %s269_s13, 256  ;;  %p1532_p2 = scmp.lt.s32.totalorder %s269_s13, %s269_s13 }
  0x29   : > { %p1525_p9 = scmp.ne.s32.totalorder %s269_s13, %s1524_s23  ;;  %p1533_p6 = scmp.lt.s32.totalorder %s1524_s23, %s1524_s23 }
  0x2b   : > { %p1527_p10 = pnand %p1525_p9, %p2196_p13  ;;  %p1534_p4 = por %p1533_p6, %p1532_p2 }
  0x2d   : > { %p1528_p1 = pneg %p1527_p10 }
  0x2f   : > { %p1535_p8 = pnand %p1534_p4, %p1528_p1 }
  0x31   : > { %1538 = shalt.err (!%p1535_p8)
}
  0x32   : > { %s2188_s8 = smov 64   ;;  %s2189_s12 = smov 4  }
  0x33   : > { %1405 = dma.hbm_to_vmem [thread:$0]  (!%p1860_p11), %s2214_s4, 256, %s269_s13, [#allocation9], %s2188_s8, %s2188_s8, %s2189_s12  }
  0x34   : > { %p48_p1 = scmp.ge.s32.totalorder %s46_s15, 2  ;;  %s55_s18 = sadd.s32 1, %s1735_s26 }
  0x35   : > { %p62_p2 = scmp.ne.s32.totalorder %s1735_s26, %s1731_s25  ;;  %p63_p4 = scmp.eq.s32.totalorder %s1747_s29, 0 }
  0x36   : > { %s2248_s15 = smov (%p48_p1, %s46_s15), 0  ;;  %p2216_p8 = scmp.eq.s32.totalorder %s1832_s30, 1 }
  0x37   : > { %2215 = sst [smem:[#allocation19_spill]] %s2248_s15  ;;  %p64_p6 = por %p63_p4, %p62_p2 }
  0x38   : > { %p1898_p10 = por %p2216_p8, %p62_p2  ;;  %s50_s20 = ssub.s32 %s1743_s28, %s2248_s15 }
  0x39   : > { %p1425_p12 = scmp.lt.s32.totalorder %s1747_s29, 2  ;;  %p53_p0 = scmp.eq.s32.totalorder %s50_s20, 0 }
  0x3a   : > { %s2217_s19 = scalar_select %p1898_p10, 1, 0 }
  0x3b   : > { %s2190_s21 = sand.u32 1, %s1735_s26   ;;  %s1911_s22 = sshll.u32 %s1743_s28, 6 }
  0x3c   : > { %s1908_s13 = sshll.u32 %s2190_s21, 2  ;;  %p1916_p3 = pnand %p1425_p12, %p64_p6 }
  0x3d   : > { %s1914_s23 = scalar_select %p53_p0, %s1735_s26, %s55_s18  }
  0x3e   : > { %s2219_s16 = scalar_select %p1916_p3, 1, 0 }
  0x3f   : > { %2218 = sst [smem:[#allocation20_spill]] %s1914_s23  ;;  %s317_s17 = sand.u32 1, %s1747_s29  }
  0x40   : > { %s2220_s1 = sld [smem:[#allocation21_spill]]  ;;  %s321_s21 = scalar_lea.vmem [#allocation5], %s1908_s13 }
  0x41   : > { %s329_s4 = sshll.u32 %s321_s21, 4  ;;  %s1752_s18 = smov [#allocation10]   ;;  %s1928_s4 = int_to_ptr.vmem [resolvable:$true] %s329_s4 }
  0x42   : > { %s1930_s15 = sshll.u32 %s1752_s18, 4  ;;  %s1932_s28 = scalar_lea.sflag [#allocation6], %s317_s17  ;;  %s282_s15 = int_to_ptr.vmem [resolvable:$true] %s1930_s15 }
  0x43   : > { %p1938_p7 = pneg %p1916_p3 }
  0x45   : > { %s2221_s8 = scalar_select %p1938_p7, 1, 0 }
  0x46   : > { %s1925_s20 = scalar_lea.hbm %s2220_s1, %s1911_s22  ;;  %s1544_s29 = scalar_lea.hbm %s2220_s1, 128 }
  0x47   : > { %s1539_s23 = scalar_lea.hbm %s1925_s20, 64  ;;  %p1545_p2 = scmp.lt.u32.totalorder %s1925_s20, %s2220_s1 }
  0x48   : > { %p1540_p5 = scmp.ne.s32.totalorder %s1925_s20, %s1539_s23  ;;  %p1546_p4 = scmp.lt.u32.totalorder %s1544_s29, %s1539_s23 }
  0x49   : > { %p1548_p8 = scmp.lt.u32.totalorder %s1539_s23, %s1925_s20 }
  0x4a   : > { %p1542_p9 = pnand %p1938_p7, %p1540_p5  ;;  %p1547_p6 = por %p1546_p4, %p1545_p2 }
  0x4c   : > { %p1543_p1 = pneg %p1542_p9  ;;  %p1549_p12 = por %p1548_p8, %p1547_p6 }
  0x4e   : > { %p1550_p0 = pnand %p1549_p12, %p1543_p1 }
  0x50   : > { %1553 = shalt.err (!%p1550_p0)
}
  0x51   : > { %s1554_s17 = scalar_lea.vmem %s1928_s4, 64  ;;  %s1753_s12 = smov [#allocation5]  }
  0x52   : > { %p1555_p5 = scmp.ne.s32.totalorder %s1928_s4, %s1554_s17  ;;  %s1559_s21 = sshll.u32 %s1753_s12, 4  ;;  %s1560_s21 = int_to_ptr.vmem [resolvable:$false] %s1559_s21 }
  0x53   : > { %s1561_s10 = scalar_lea.vmem %s1560_s21, 128  ;;  %p1562_p10 = scmp.lt.s32.totalorder %s1928_s4, %s1560_s21 }
  0x54   : > { %p1557_p9 = pnand %p1555_p5, %p1938_p7  ;;  %p1563_p11 = scmp.lt.s32.totalorder %s1561_s10, %s1554_s17 }
  0x56   : > { %p1558_p13 = pneg %p1557_p9  ;;  %p1564_p2 = por %p1563_p11, %p1562_p10 }
  0x58   : > { %p1565_p4 = pnand %p1564_p2, %p1558_p13 }
  0x5a   : > { %1568 = shalt.err (!%p1565_p4)
}
  0x5b   : > { %1415 = dma.hbm_to_vmem [thread:$0]  (!%p1916_p3), %s1925_s20, 64, %s1928_s4, %s1932_s28  }
  0x5c   : > { %s2222_s5 = sld [smem:[#allocation23_spill]]  ;;  %p2223_p11 = scmp.ne.s32.totalorder %s2213_s14, 0 }
  0x5e   : > { %p2224_p13 = pneg %p2223_p11 }
  0x62   : > { %s1569_s18 = scalar_lea.hbm %s2222_s5, 1024 }
  0x63   : > { %p1570_p1 = scmp.ne.s32.totalorder %s2222_s5, %s1569_s18  ;;  %p1576_p8 = scmp.lt.u32.totalorder %s1569_s18, %s2222_s5 }
  0x65   : > { %p1572_p10 = pnand %p1570_p1, %p2224_p13 }
  0x67   : > { %p1573_p6 = pneg %p1572_p10 }
  0x69   : > { %p1578_p12 = pnand %p1576_p8, %p1573_p6 }
  0x6b   : > { %1581 = shalt.err (!%p1578_p12)
}
  0x6c   : > { %s1582_s4 = scalar_lea.vmem %s282_s15, 1024  ;;  %p2225_p5 = pmov %p2224_p13 }
  0x6d   : > { %p1583_p0 = scmp.ne.s32.totalorder %s282_s15, %s1582_s4  ;;  %p1590_p4 = scmp.lt.s32.totalorder %s282_s15, %s282_s15 }
  0x6e   : > { %p1591_p3 = scmp.lt.s32.totalorder %s1582_s4, %s1582_s4 }
  0x6f   : > { %p1585_p9 = pnand %p1583_p0, %p2225_p5 }
  0x70   : > { %p1592_p7 = por %p1591_p3, %p1590_p4 }
  0x71   : > { %p1586_p2 = pneg %p1585_p9 }
  0x73   : > { %p1593_p1 = pnand %p1592_p7, %p1586_p2 }
  0x75   : > { %1596 = shalt.err (!%p1593_p1)
}
  0x76   : > { %s2226_s1 = smov 4   ;;  %s2227_s20 = smov 64  }
  0x77   : > { %1408 = dma.hbm_to_vmem [thread:$0]  (!%p2223_p11), %s2222_s5, 1024, %s282_s15, [#allocation9], %s2227_s20, %s2227_s20, %s2226_s1  }
  0x78   : > { %s1990_s12 = scalar_lea.hbm %s2177_s0, %s1911_s22  ;;  %s302_s14 = scalar_lea.vmem [#allocation2], %s1908_s13 }
  0x79   : > { %s310_s17 = sshll.u32 %s302_s14, 4  ;;  %s1999_s10 = scalar_lea.hbm %s2179_s2, %s1911_s22  ;;  %s1993_s17 = int_to_ptr.vmem [resolvable:$true] %s310_s17 }
  0x7a   : > { %s2228_s29 = sand.u32 1, %s1735_s26   ;;  %s1597_s1 = scalar_lea.hbm %s1990_s12, 64 }
  0x7b   : > { %s299_s15 = scalar_lea.sflag [#allocation3], %s2228_s29  ;;  %p1598_p3 = scmp.ne.s32.totalorder %s1990_s12, %s1597_s1 }
  0x7c   : > { %p2229_p7 = scmp.ne.s32.totalorder %s2221_s8, 0  ;;  %s1602_s18 = scalar_lea.hbm %s2177_s0, 128 }
  0x7d   : > { %p1603_p10 = scmp.lt.u32.totalorder %s1990_s12, %s2177_s0  ;;  %p1604_p6 = scmp.lt.u32.totalorder %s1602_s18, %s1597_s1 }
  0x7e   : > { %p1600_p11 = pnand %p1598_p3, %p2229_p7  ;;  %p1606_p12 = scmp.lt.u32.totalorder %s1597_s1, %s1990_s12 }
  0x7f   : > { %p1605_p8 = por %p1604_p6, %p1603_p10 }
  0x80   : > { %p1601_p13 = pneg %p1600_p11 }
  0x81   : > { %p1607_p0 = por %p1606_p12, %p1605_p8 }
  0x83   : > { %p1608_p5 = pnand %p1607_p0, %p1601_p13 }
  0x85   : > { %1611 = shalt.err (!%p1608_p5)
}
  0x86   : > { %s1612_s22 = scalar_lea.vmem %s1993_s17, 64  ;;  %s1754_s21 = smov [#allocation2]  }
  0x87   : > { %p1613_p9 = scmp.ne.s32.totalorder %s1993_s17, %s1612_s22  ;;  %s1617_s4 = sshll.u32 %s1754_s21, 4  ;;  %s1618_s4 = int_to_ptr.vmem [resolvable:$false] %s1617_s4 }
  0x88   : > { %s1619_s5 = scalar_lea.vmem %s1618_s4, 128  ;;  %p1620_p1 = scmp.lt.s32.totalorder %s1993_s17, %s1618_s4 }
  0x89   : > { %p1615_p2 = pnand %p1613_p9, %p2229_p7  ;;  %p1621_p3 = scmp.lt.s32.totalorder %s1619_s5, %s1612_s22 }
  0x8b   : > { %p1616_p4 = pneg %p1615_p2  ;;  %p1622_p11 = por %p1621_p3, %p1620_p1 }
  0x8d   : > { %p1623_p10 = pnand %p1622_p11, %p1616_p4 }
  0x8f   : > { %1626 = shalt.err (!%p1623_p10)
}
  0x90   : > { %p2230_p13 = scmp.ne.s32.totalorder %s2219_s16, 0  ;;  %s340_s29 = scalar_lea.vmem [#allocation7], %s1908_s13 }
  0x91   : > { %s348_s1 = sshll.u32 %s340_s29, 4  ;;  %s1627_s20 = scalar_lea.hbm %s1999_s10, 64  ;;  %s349_s1 = int_to_ptr.vmem [resolvable:$true] %s348_s1 }
  0x92   : > { %1412 = dma.hbm_to_vmem [thread:$0]  (!%p2230_p13), %s1990_s12, 64, %s1993_s17, %s299_s15  }
  0x93   : > { %p1628_p6 = scmp.ne.s32.totalorder %s1999_s10, %s1627_s20  ;;  %s1632_s14 = scalar_lea.hbm %s2179_s2, 128 }
  0x94   : > { %p1633_p0 = scmp.lt.u32.totalorder %s1999_s10, %s2179_s2  ;;  %p1634_p5 = scmp.lt.u32.totalorder %s1632_s14, %s1627_s20 }
  0x95   : > { %p1630_p8 = pnand %p1628_p6, %p2229_p7  ;;  %p1636_p2 = scmp.lt.u32.totalorder %s1627_s20, %s1999_s10 }
  0x96   : > { %p1635_p9 = por %p1634_p5, %p1633_p0 }
  0x97   : > { %p1631_p12 = pneg %p1630_p8 }
  0x98   : > { %p1637_p4 = por %p1636_p2, %p1635_p9 }
  0x9a   : > { %p1638_p1 = pnand %p1637_p4, %p1631_p12 }
  0x9c   : > { %1641 = shalt.err (!%p1638_p1)
}
  0x9d   : > { %s1642_s13 = scalar_lea.vmem %s349_s1, 64  ;;  %s1755_s12 = smov [#allocation7]  }
  0x9e   : > { %p1643_p3 = scmp.ne.s32.totalorder %s349_s1, %s1642_s13  ;;  %s1647_s17 = sshll.u32 %s1755_s12, 4  ;;  %s1648_s17 = int_to_ptr.vmem [resolvable:$false] %s1647_s17 }
  0x9f   : > { %s1649_s15 = scalar_lea.vmem %s1648_s17, 128  ;;  %p1650_p6 = scmp.lt.s32.totalorder %s349_s1, %s1648_s17 }
  0xa0   : > { %p1645_p11 = pnand %p1643_p3, %p2229_p7  ;;  %p1651_p8 = scmp.lt.s32.totalorder %s1649_s15, %s1642_s13 }
  0xa2   : > { %p1646_p10 = pneg %p1645_p11  ;;  %p1652_p13 = por %p1651_p8, %p1650_p6 }
  0xa4   : > { %p1653_p0 = pnand %p1652_p13, %p1646_p10 }
  0xa6   : > { %1656 = shalt.err (!%p1653_p0)
}
  0xa7   : > { %p2231_p5 = scmp.ne.s32.totalorder %s2219_s16, 0  ;;  %p2232_p12 = scmp.ne.s32.totalorder %s2212_s11, 0 }
  0xa8   : > { %s2046_s8 = sand.u32 (!%p2232_p12), 1, %s1731_s25   ;;  %p2233_p7 = scmp.ne.s32.totalorder (!%p2232_p12), %s2209_s9, 0 }
  0xa9   : > { %1418 = dma.hbm_to_vmem [thread:$0]  (!%p2231_p5), %s1999_s10, 64, %s349_s1, %s1932_s28  }
  0xaa   : > { %367 = sbr.rel (%p2232_p12) target bundleno = 686 (0x2ae), region = 48  ;;  %s2049_s4 = sshll.u32 (!%p2232_p12), %s2046_s8, 2 }
  0xab   : > { %s370_s5 = scalar_lea.sflag (!%p2232_p12), [#allocation3], %s2046_s8  ;;  %s373_s29 = scalar_lea.vmem (!%p2232_p12), [#allocation2], %s2049_s4 }
  0xb1   : > { %1710 = dma.done.wait (%p2233_p7), %s370_s5, 64  }
  0xb2   : > { %1712 = vsyncadd (%p2233_p7), %s370_s5, 4294967232  ;;  %s378_s28 = sand.u32 1, %s1832_s30   ;;  %s382_s16 = scalar_lea.vmem [#allocation5], %s2049_s4 }
  0xb3   : > { %s379_s11 = scalar_lea.sflag [#allocation6], %s378_s28 }
  0xb4   : > { %1714 = dma.done.wait (%p2233_p7), %s379_s11, 128  }
  0xb5   : > { %1716 = vsyncadd (%p2233_p7), %s379_s11, 4294967168  ;;  %s391_s10 = scalar_lea.vmem [#allocation7], %s2049_s4  ;;  %p2234_p13 = scmp.eq.s32.totalorder %s1832_s30, 0 }
  0xb7   : > { %1718 = dma.done.wait (%p2234_p13), [#allocation9], 1280   ;;  %p2235_p9 = pmov %p2234_p13 }
  0xb8   : > { %v493_v0 = vlaneseq  ;;  %v1756_v1 = vmov 1966171168   ;;  %v1485_v6 = vld [vmem:[#allocation8] sm:$0xff]   ;;  %v1486_v7 = vld [vmem:[#allocation8 + $0x8] sm:$0xff]   ;;  %v1487_v12 = vld [vmem:[#allocation10] sm:$0xff]   ;;  %vm650_vm0 = vcmask 261120  }
  0xb9   : > { %1720 = vsyncadd (%p2235_p9), [#allocation9], 4294966016  ;;  %v491_v2 = vunpack.c.l.s4 %v1756_v1  ;;  %1350 = vmatprep.subr.bf16.mxu0 %v1485_v6  ;;  %v1270_v8 = vld.sshfl [vmem:[%s373_s29] sm:$0x33 pattern:$0x75316420]  ;;  %1362 = vmatprep.subr.bf16.mxu1 %v1487_v12 }
  0xba   : > { %v2068_v3 = vshrl.u32 %v493_v0, 7  ;;  %1351 = vmatpush3.bf16.msra.mxu0 %v1485_v6  ;;  %v489_v9 = vcombine.high %v1270_v8, %v1270_v8  ;;  %v1488_v13 = vld [vmem:[#allocation10 + $0x8] sm:$0xff]   ;;  %1363 = vmatpush3.bf16.msra.mxu1 %v1487_v12  ;;  %v456_v29 = vld [vmem:[%s382_s16] sm:$0xf]  ;;  %p447_p2 = scmp.lt.s32.totalorder %s1739_s27, 1  ;;  %s1268_s22 = sshll.u32 %s2046_s8, 5 }
  0xbb   : > { %v492_v4 = vunpack.c.0.s8 %v491_v2  ;;  %1352 = vmatprep.subr.bf16.mxu0 %v1486_v7  ;;  %1364 = vmatprep.subr.bf16.mxu1 %v1488_v13  ;;  %v1489_v2 = vld [vmem:[#allocation10 + $0x10] sm:$0xff]   ;;  %v1491_v6 = vld [vmem:[#allocation10 + $0x20] sm:$0xff]   ;;  %s446_s21 = scalar_lea.vmem [#allocation11], %s1268_s22  ;;  %s1308_s12 = sshll.u32 %s1739_s27, 9 }
  0xbc   : > { %v2075_v11 = vsub.s32 0, %v2068_v3  ;;  %s448_s30 = scalar_select %p447_p2, %s1739_s27, 1 }
  0xbd   : > { %v2071_v5 = vsub.s32 %v492_v4, %v2068_v3  ;;  %v1490_v4 = vld [vmem:[#allocation10 + $0x18] sm:$0xff]   ;;  %s1082_s13 = sshll.u32 %s446_s21, 4  ;;  %s2128_s4 = scalar_lea.hbm %s2184_s7, %s1308_s12  ;;  %s2123_s13 = int_to_ptr.vmem [resolvable:$true] %s1082_s13 }
  0xbe   : > { %1353 = vmatpush3.bf16.msra.mxu0 %v1486_v7  ;;  %1365 = vmatpush3.bf16.msra.mxu1 %v1488_v13  ;;  %v1492_v7 = vld [vmem:[#allocation10 + $0x28] sm:$0xff]   ;;  %v1757_v13 = vmov 286326784   ;;  %s1269_s9 = sshll.u32 %s448_s30, 2  ;;  %s1066_s27 = scalar_lea.sflag [#allocation4], %s2046_s8 }
  0xbf   : > { %v496_v10 = vrot.slane %v1270_v8, %v2071_v5  ;;  %v503_v14 = vrot.slane %v489_v9, %v2071_v5  ;;  %1366 = vmatprep.subr.bf16.mxu1 %v1489_v2  ;;  %v1493_v8 = vld [vmem:[#allocation10 + $0x30] sm:$0xff]   ;;  %v1494_v9 = vld [vmem:[#allocation10 + $0x38] sm:$0xff]   ;;  %s453_s23 = scalar_lea.vmem %s2180_s3, %s1269_s9  ;;  %s1657_s5 = scalar_lea.vmem %s2123_s13, 512 }
  0xc0   : > { %p1658_p4 = scmp.ne.s32.totalorder %s2123_s13, %s1657_s5  ;;  %p2236_p1 = scmp.ne.s32.totalorder %s2217_s19, 0 }
  0xc1   : > { %v507_v15 = vunpack.i.h.s16 %v496_v10  ;;  %v1271_v16 = vpack.i.b16 %v496_v10, %v496_v10  ;;  %v504_v17 = vcombine.high %v496_v10, %v496_v10  ;;  %v509_v20 = vunpack.i.h.s16 %v503_v14  ;;  %v1285_v10 = vld.sshfl [vmem:[%s391_s10] sm:$0x33 pattern:$0x75316420]  ;;  %s1758_s29 = smov [#allocation11]  }
  0xc2   : > { %v1272_v21 = vpack.i.b16 %v503_v14, %v503_v14  ;;  %v505_v24 = vcombine.high %v503_v14, %v503_v14  ;;  %1367 = vmatpush3.bf16.msra.mxu1 %v1489_v2  ;;  %v745_v12 = vcombine.high %v1285_v10, %v1285_v10  ;;  %v779_v14 = vunpack.c.l.s4 %v1757_v13  ;;  %p1659_p3 = pnand %p1658_p4, %p2236_p1  ;;  %s1661_s28 = sshll.u32 %s1758_s29, 4  ;;  %s1662_s28 = int_to_ptr.vmem [resolvable:$false] %s1661_s28 }
  0xc3   : > { %v515_v18 = vpack.i.b16 %v507_v15, %v507_v15  ;;  %v525_v19 = vrot.slane %v1271_v16, %v2075_v11  ;;  %v511_v22 = vunpack.i.h.s16 %v504_v17  ;;  %v1273_v23 = vpack.i.b16 %v504_v17, %v504_v17  ;;  %1368 = vmatprep.subr.bf16.mxu1 %v1490_v4  ;;  %s1663_s11 = scalar_lea.vmem %s1662_s28, 1024  ;;  %p1664_p10 = scmp.lt.s32.totalorder %s2123_s13, %s1662_s28 }
  0xc4   : > { %v517_v27 = vpack.i.b16 %v509_v20, %v509_v20  ;;  %v533_v28 = vrot.slane %v1272_v21, %v2075_v11  ;;  %v513_v32 = vunpack.i.h.s16 %v505_v24  ;;  %v1274_v33 = vpack.i.b16 %v505_v24, %v505_v24  ;;  %p1660_p11 = pneg %p1659_p3  ;;  %p1665_p6 = scmp.lt.s32.totalorder %s1663_s11, %s1657_s5 }
  0xc5   : > { %v529_v25 = vrot.slane %v515_v18, %v2075_v11  ;;  %v555_v26 = vpack.i.b16 %v525_v19, %v525_v19  ;;  %v519_v30 = vpack.i.b16 %v511_v22, %v511_v22  ;;  %v541_v31 = vrot.slane %v1273_v23, %v2075_v11 }
  0xc6   : > { %v537_v36 = vrot.slane %v517_v27, %v2075_v11  ;;  %v569_v37 = vpack.i.b16 %v533_v28, %v533_v28  ;;  %v521_v40 = vpack.i.b16 %v513_v32, %v513_v32  ;;  %v549_v41 = vrot.slane %v1274_v33, %v2075_v11  ;;  %1369 = vmatpush3.bf16.msra.mxu1 %v1490_v4  ;;  %p1666_p8 = por %p1665_p6, %p1664_p10 }
  0xc7   : > { %v560_v34 = vrot.slane %v555_v26, %v2075_v11  ;;  %v562_v35 = vpack.i.b16 %v529_v25, %v529_v25  ;;  %v545_v38 = vrot.slane %v519_v30, %v2075_v11  ;;  %v583_v39 = vpack.i.b16 %v541_v31, %v541_v31  ;;  %1370 = vmatprep.subr.bf16.mxu1 %v1491_v6  ;;  %v457_v30 = vld [vmem:[%s453_s23] sm:$0xf] }
  0xc8   : > { %v574_v44 = vrot.slane %v569_v37, %v2075_v11  ;;  %v576_v45 = vpack.i.b16 %v537_v36, %v537_v36  ;;  %v553_v48 = vrot.slane %v521_v40, %v2075_v11  ;;  %v597_v49 = vpack.i.b16 %v549_v41, %v549_v41  ;;  %p1667_p0 = pnand %p1666_p8, %p1660_p11 }
  0xc9   : > { %v567_v42 = vrot.slane %v562_v35, %v2075_v11  ;;  %v610_v43 = vmul.bf16 %v560_v34, %v456_v29  ;;  %v588_v46 = vrot.slane %v583_v39, %v2075_v11  ;;  %v590_v47 = vpack.i.b16 %v545_v38, %v545_v38 }
  0xca   : > { %v581_v51 = vrot.slane %v576_v45, %v2075_v11  ;;  %v612_v52 = vmul.bf16 %v574_v44, %v456_v29  ;;  %v604_v55 = vpack.i.b16 %v553_v48, %v553_v48  ;;  %v602_v58 = vrot.slane %v597_v49, %v2075_v11  ;;  %1371 = vmatpush3.bf16.msra.mxu1 %v1491_v6 }
  0xcb   : > { %v611_v50 = vmul.bf16 %v567_v42, %v456_v29  ;;  %v595_v53 = vrot.slane %v590_v47, %v2075_v11  ;;  %v614_v54 = vmul.bf16 %v588_v46, %v456_v29  ;;  %1372 = vmatprep.subr.bf16.mxu1 %v1492_v7  ;;  %v759_v15 = vrot.slane %v745_v12, %v2071_v5 }
  0xcc   : > { %v613_v57 = vmul.bf16 %v581_v51, %v456_v29  ;;  %v609_v60 = vrot.slane %v604_v55, %v2075_v11  ;;  %v616_v63 = vmul.bf16 %v602_v58, %v456_v29  ;;  %v752_v16 = vrot.slane %v1285_v10, %v2071_v5 }
  0xcd   : > { %v1275_v56 = vcombine.low %v610_v43, %v611_v50  ;;  %v615_v59 = vmul.bf16 %v595_v53, %v456_v29  ;;  %v780_v17 = vunpack.c.0.s8 %v779_v14  ;;  %v765_v18 = vunpack.i.h.s16 %v759_v15 }
  0xce   : > { %v1276_v61 = vcombine.low %v612_v52, %v613_v57  ;;  %v617_v0 = vmul.bf16 %v609_v60, %v456_v29  ;;  %1373 = vmatpush3.bf16.msra.mxu1 %v1492_v7  ;;  %v763_v19 = vunpack.i.h.s16 %v752_v16  ;;  %v1287_v21 = vpack.i.b16 %v759_v15, %v759_v15 }
  0xcf   : > { %1354 = vmatprep.mubr.msk.bf16.mxu0 %vm650_vm0, %v1275_v56  ;;  %v1277_v62 = vcombine.low %v614_v54, %v615_v59  ;;  %1374 = vmatprep.subr.bf16.mxu1 %v1493_v8  ;;  %v783_v20 = vsub.s32 %v780_v17, %v2068_v3  ;;  %v1286_v22 = vpack.i.b16 %v752_v16, %v752_v16  ;;  %v728_v36 = vunpack.c.l.bf16 %v457_v30 }
  0xd0   : > { %1355 = vmatmul.mubr.msk.bf16.vlgmr.msra.gmra.mrb[0].mxu0 %vm650_vm0, %v1276_v61  ;;  %v1278_v1 = vcombine.low %v616_v63, %v617_v0  ;;  %v773_v23 = vpack.i.b16 %v765_v18, %v765_v18  ;;  %v761_v24 = vcombine.high %v759_v15, %v759_v15  ;;  %v771_v25 = vpack.i.b16 %v763_v19, %v763_v19 }
  0xd1   : > { %1358 = vmatprep.mubr.msk.bf16.mxu0 %vm650_vm0, %v1277_v62  ;;  %v760_v26 = vcombine.high %v752_v16, %v752_v16  ;;  %v798_v27 = vrot.slane %v1287_v21, %v783_v20  ;;  %v784_v28 = vrot.slane %v1286_v22, %v783_v20 }
  0xd2   : > { %1375 = vmatpush3.bf16.msra.mxu1 %v1493_v8  ;;  %v805_v5 = vrot.slane %v773_v23, %v783_v20  ;;  %v769_v29 = vunpack.i.h.s16 %v761_v24  ;;  %v791_v31 = vrot.slane %v771_v25, %v783_v20  ;;  %v1289_v3 = vpack.i.b16 %v761_v24, %v761_v24 }
  0xd3   : > { %1376 = vmatprep.subr.bf16.mxu1 %v1494_v9  ;;  %v767_v32 = vunpack.i.h.s16 %v760_v26  ;;  %v844_v33 = vunpack.c.l.bf16 %v798_v27  ;;  %v842_v34 = vunpack.c.l.bf16 %v784_v28  ;;  %v1288_v35 = vpack.i.b16 %v760_v26, %v760_v26 }
  0xd4   : > { %v845_v37 = vunpack.c.l.bf16 %v805_v5  ;;  %v777_v38 = vpack.i.b16 %v769_v29, %v769_v29  ;;  %v843_v39 = vunpack.c.l.bf16 %v791_v31  ;;  %v826_v42 = vrot.slane %v1289_v3, %v783_v20 }
  0xd5   : > { %v775_v40 = vpack.i.b16 %v767_v32, %v767_v32  ;;  %v861_v41 = vrot.slane %v844_v33, %v2075_v11  ;;  %v853_v44 = vrot.slane %v842_v34, %v2075_v11  ;;  %v812_v45 = vrot.slane %v1288_v35, %v783_v20 }
  0xd6   : > { %1377 = vmatpush3.bf16.msra.mxu1 %v1494_v9  ;;  %v865_v48 = vrot.slane %v845_v37, %v2075_v11  ;;  %v833_v49 = vrot.slane %v777_v38, %v783_v20  ;;  %v857_v52 = vrot.slane %v843_v39, %v2075_v11  ;;  %v848_v57 = vunpack.c.l.bf16 %v826_v42  ;;  %v1290_v38 = vld [vmem:[%s2183_s6] ss:$0 sm:$0xff] }
  0xd7   : > { %v819_v53 = vrot.slane %v775_v40, %v783_v20  ;;  %v846_v60 = vunpack.c.l.bf16 %v812_v45 }
  0xd8   : > { %1359 = vmatmul.mubr.msk.bf16.gmra.mrb[4].mxu0 %vm650_vm0, %v1278_v1  ;;  %v849_v63 = vunpack.c.l.bf16 %v833_v49  ;;  %v877_v6 = vrot.slane %v848_v57, %v2075_v11 }
  0xd9   : > { %v847_v2 = vunpack.c.l.bf16 %v819_v53  ;;  %v869_v9 = vrot.slane %v846_v60, %v2075_v11 }
  0xda   : > { %v881_v13 = vrot.slane %v849_v63, %v2075_v11 }
  0xdb   : > { %v873_v16 = vrot.slane %v847_v2, %v2075_v11 }
 0x1a3   : > { %v1356_v43 = vpop.f32.mrb[0].mxu0 }
 0x1a4   : > { %v731_v46 = vadd.f32 %v1356_v43, %v728_v36  ;;  %v697_v47 = vpop.f32.mrb[1].mxu0 }
 0x1a5   : > { %v729_v50 = vadd.f32 %v728_v36, %v697_v47  ;;  %v1357_v51 = vpop.f32.mrb[2].mxu0 }
 0x1a6   : > { %v884_v54 = vadd.f32 %v861_v41, %v731_v46  ;;  %v732_v55 = vadd.f32 %v1357_v51, %v728_v36  ;;  %v700_v56 = vpop.f32.mrb[3].mxu0 }
 0x1a7   : > { %v882_v58 = vadd.f32 %v853_v44, %v729_v50  ;;  %v730_v59 = vadd.f32 %v728_v36, %v700_v56 }
 0x1a8   : > { %v892_v61 = vpack.c.bf16 %v884_v54, %v884_v54  ;;  %v885_v62 = vadd.f32 %v865_v48, %v732_v55 }
 0x1a9   : > { %v890_v0 = vpack.c.bf16 %v882_v58, %v882_v58  ;;  %v883_v1 = vadd.f32 %v857_v52, %v730_v59 }
 0x1aa   : > { %1495 = vtanh.bf16 %v892_v61  ;;  %v893_v4 = vpack.c.bf16 %v885_v62, %v885_v62 }
 0x1ab   : > { %1497 = vtanh.bf16 %v890_v0  ;;  %v891_v7 = vpack.c.bf16 %v883_v1, %v883_v1  ;;  %v1360_v8 = vpop.f32.mrb[4].mxu0 }
 0x1ac   : > { %1499 = vtanh.bf16 %v893_v4  ;;  %v735_v10 = vadd.f32 %v1360_v8, %v728_v36  ;;  %v713_v12 = vpop.f32.mrb[5].mxu0 }
 0x1ad   : > { %1501 = vtanh.bf16 %v891_v7  ;;  %v733_v14 = vadd.f32 %v728_v36, %v713_v12  ;;  %v1361_v15 = vpop.f32.mrb[6].mxu0 }
 0x1ae   : > { %v888_v17 = vadd.f32 %v877_v6, %v735_v10  ;;  %v736_v18 = vadd.f32 %v1361_v15, %v728_v36  ;;  %v716_v19 = vpop.f32.mrb[7].mxu0 }
 0x1af   : > { %v886_v20 = vadd.f32 %v869_v9, %v733_v14  ;;  %v734_v21 = vadd.f32 %v728_v36, %v716_v19 }
 0x1b0   : > { %v896_v22 = vpack.c.bf16 %v888_v17, %v888_v17  ;;  %v889_v23 = vadd.f32 %v881_v13, %v736_v18 }
 0x1b1   : > { %v894_v24 = vpack.c.bf16 %v886_v20, %v886_v20  ;;  %v887_v25 = vadd.f32 %v873_v16, %v734_v21 }
 0x1b2   : > { %1503 = vtanh.bf16 %v896_v22  ;;  %v897_v26 = vpack.c.bf16 %v889_v23, %v889_v23 }
 0x1b3   : > { %1505 = vtanh.bf16 %v894_v24  ;;  %v895_v27 = vpack.c.bf16 %v887_v25, %v887_v25 }
 0x1b4   : > { %1507 = vtanh.bf16 %v897_v26 }
 0x1b5   : > { %v1496_v28 = vpop.eup %1495  ;;  %1509 = vtanh.bf16 %v895_v27 }
 0x1b6   : > { %v1498_v5 = vpop.eup %1497 }
 0x1b7   : > { %v1500_v29 = vpop.eup %1499 }
 0x1b8   : > { %v1502_v30 = vpop.eup %1501  ;;  %v1292_v11 = vcombine.low %v1496_v28, %v1500_v29 }
 0x1b9   : > { %v1291_v31 = vcombine.low %v1498_v5, %v1502_v30 }
 0x1bb   : > { %1378 = vmatprep.mubr.bf16.mxu1 %v1291_v31 }
 0x1bc   : > { %1379 = vmatmul.mubr.bf16.vlgmr.msra.gmra.mrb[0].mxu1 %v1292_v11 }
 0x1bd   : > { %v1504_v32 = vpop.eup %1503 }
 0x1be   : > { %v1506_v33 = vpop.eup %1505 }
 0x1bf   : > { %v1508_v3 = vpop.eup %1507 }
 0x1c0   : > { %v1510_v34 = vpop.eup %1509  ;;  %v1294_v35 = vcombine.low %v1504_v32, %v1508_v3 }
 0x1c1   : > { %v1293_v36 = vcombine.low %v1506_v33, %v1510_v34 }
 0x1c3   : > { %1382 = vmatprep.mubr.bf16.mxu1 %v1293_v36 }
 0x1c4   : > { %1383 = vmatmul.mubr.bf16.gmra.mrb[4].mxu1 %v1294_v35 }
 0x28f   : > { %v1380_v37 = vpop.f32.mrb[0].mxu1 }
 0x290   : > { %v1018_v39 = vpop.f32.mrb[1].mxu1  ;;  %v1027_v41 = vadd.f32 %v1380_v37, %v1290_v38 }
 0x291   : > { %v1381_v40 = vpop.f32.mrb[2].mxu1  ;;  %v1019_v44 = vadd.f32 %v1290_v38, %v1018_v39 }
 0x292   : > { %v1030_v42 = vadd.f32 %v1381_v40, %v1290_v38  ;;  %v1021_v43 = vpop.f32.mrb[3].mxu1 }
 0x293   : > { %v1022_v45 = vadd.f32 %v1290_v38, %v1021_v43 }
 0x294   : > { %v1317_v46 = vpack.c.bf16 %v1030_v42, %v1027_v41 }
 0x295   : > { %v1312_v47 = vpack.c.bf16 %v1022_v45, %v1019_v44 }
 0x296   : > { %1329 = vst [vmem:[%s446_s21 + $0x8] sm:$0xff] %v1317_v46  }
 0x297   : > { %1313 = vst [vmem:[%s446_s21] sm:$0xff] %v1312_v47   ;;  %v1384_v48 = vpop.f32.mrb[4].mxu1 }
 0x298   : > { %v1034_v49 = vpop.f32.mrb[5].mxu1  ;;  %v1043_v51 = vadd.f32 %v1384_v48, %v1290_v38 }
 0x299   : > { %v1385_v50 = vpop.f32.mrb[6].mxu1  ;;  %v1035_v54 = vadd.f32 %v1290_v38, %v1034_v49 }
 0x29a   : > { %v1046_v52 = vadd.f32 %v1385_v50, %v1290_v38  ;;  %v1037_v53 = vpop.f32.mrb[7].mxu1 }
 0x29b   : > { %v1038_v55 = vadd.f32 %v1290_v38, %v1037_v53 }
 0x29c   : > { %v1327_v56 = vpack.c.bf16 %v1046_v52, %v1043_v51 }
 0x29d   : > { %v1322_v57 = vpack.c.bf16 %v1038_v55, %v1035_v54 }
 0x29e   : > { %1331 = vst [vmem:[%s446_s21 + $0x18] sm:$0xff] %v1327_v56  }
 0x29f   : > { %1330 = vst [vmem:[%s446_s21 + $0x10] sm:$0xff] %v1322_v57  }
 0x2a0   : > { %1670 = shalt.err (!%p1667_p0)
}
 0x2a1   : > { %s1671_s16 = scalar_lea.hbm %s2128_s4, 512  ;;  %s1675_s9 = scalar_lea.hbm %s2184_s7, 1024 }
 0x2a2   : > { %p1672_p5 = scmp.ne.s32.totalorder %s2128_s4, %s1671_s16  ;;  %p1676_p13 = scmp.lt.u32.totalorder %s2128_s4, %s2184_s7 }
 0x2a3   : > { %p1677_p9 = scmp.lt.u32.totalorder %s1675_s9, %s1671_s16  ;;  %p1679_p4 = scmp.lt.u32.totalorder %s1671_s16, %s2128_s4 }
 0x2a4   : > { %p1673_p12 = pnand %p1672_p5, %p2236_p1 }
 0x2a5   : > { %p1678_p2 = por %p1677_p9, %p1676_p13 }
 0x2a6   : > { %p1674_p7 = pneg %p1673_p12 }
 0x2a7   : > { %p1680_p3 = por %p1679_p4, %p1678_p2 }
 0x2a9   : > { %p1681_p11 = pnand %p1680_p3, %p1674_p7 }
 0x2ab   : > { %1684 = shalt.err (!%p1681_p11)
}
 0x2ac   : > { %s1759_s23 = smov 64   ;;  %s1760_s18 = smov 4  }
 0x2ad   : > { %1400 = dma.vmem_to_hbm [thread:$0]  (%p2236_p1), %s2123_s13, 512, %s2128_s4, %s1066_s27, %s1759_s23, %s1759_s23, %s1760_s18  }
 0x2ae PF: > { %s2237_s14 = sld [smem:[#allocation18_spill]]  ;;  %s2238_s22 = sld [smem:[#allocation17_spill]] }
 0x2af   : > { %s1097_s21 = sand.u32 1, %s1727_s24  }
 0x2b0   : > { %s1098_s12 = scalar_lea.sflag [#allocation4], %s1097_s21 }
 0x2b4   : > { %p2239_p10 = scmp.ne.s32.totalorder %s2237_s14, 0  ;;  %p2240_p6 = scmp.ge.s32.totalorder %s2238_s22, 2 }
 0x2b6   : > { %p1420_p8 = pnand %p2240_p6, %p2239_p10 }
 0x2b8   : > { %1722 = dma.done.wait (!%p1420_p8), %s1098_s12, 512  }
 0x2b9   : > { %1724 = vsyncadd (!%p1420_p8), %s1098_s12, 4294966784  ;;  %s27_s29 = sadd.s32 1, %s2238_s22   ;;  %s2241_s17 = sld [smem:[#allocation20_spill]] }
 0x2ba   : > { %p24_p0 = scmp.ge.s32.totalorder %s27_s29, 4   ;;  %s2242_s27 = sld [smem:[#allocation16_spill]] }
 0x2bb   : > { %s2243_s28 = sld [smem:[#allocation19_spill]]  ;;  %s2244_s24 = smov %s1731_s25 }
 0x2bc   : > { %s2245_s25 = smov %s1735_s26  ;;  %26 = sbr.rel (!%p24_p0) target bundleno = 13 (0xd), region = 128 }
 0x2bf   : > { %s2246_s26 = smov %s2241_s17 }
 0x2c3   :  { %1103 = vsyncpa [#allocation3], 1 }
 0x2c4   :  { %1105 = vsyncpa [#allocation3 + $0x1], 1 }
 0x2c5   :  { %1106 = vsyncpa [#allocation6], 1 }
 0x2c6   :  { %1108 = vsyncpa [#allocation6 + $0x1], 1 }
 0x2c7   :  { %1109 = vsyncpa [#allocation9], 1 }
 0x2c8   :  { %1110 = vsyncpa [#allocation4], 1 }
 0x2c9   :  { %1112 = vsyncpa [#allocation4 + $0x1], 1 }

// kernel: tpu_custom_call.1
= control target key start
LH: loop header
LB: loop body
LE: loop exit
PB: predicated region body
PF: predicated region fallthrough
CT: control target
= control target key end

     0   :  { %s2177_s0 = inlined_call_operand.hbm [shape: bf16[2,8,32], index: 0, kind: input, shape index: {}]   ;;  %s2178_s1 = inlined_call_operand.hbm [shape: bf16[2,8,32], index: 1, kind: input, shape index: {}]   ;;  %s2179_s2 = inlined_call_operand.hbm [shape: bf16[2,8,128], index: 2, kind: input, shape index: {}]   ;;  %s2180_s3 = inlined_call_operand.vmem [shape: bf16[2,8,128], index: 3, kind: input, shape index: {}]   ;;  %s2181_s4 = inlined_call_operand.hbm [shape: bf16[32,128], index: 4, kind: input, shape index: {}]   ;;  %s2182_s5 = inlined_call_operand.hbm [shape: bf16[128,128], index: 5, kind: input, shape index: {}]   ;;  %s2183_s6 = inlined_call_operand.vmem [shape: f32[1,128], index: 6, kind: input, shape index: {}]   ;;  %s2184_s7 = inlined_call_operand.hbm [shape: bf16[2,8,8,128], index: 7, kind: output, shape index: {}]  }
   0x1   :  { %2204 = sst [smem:[#allocation21_spill]] %s2178_s1 }
   0x2   :  { %2205 = sst [smem:[#allocation22_spill]] %s2181_s4 }
   0x3   :  { %2206 = sst [smem:[#allocation23_spill]] %s2182_s5 }
   0x4   :  { %12 = vsyncpa [#allocation3], 0 }
   0x5   :  { %14 = vsyncpa [#allocation3 + $0x1], 0 }
   0x6   :  { %15 = vsyncpa [#allocation6], 0 }
   0x7   :  { %17 = vsyncpa [#allocation6 + $0x1], 0 }
   0x8   :  { %18 = vsyncpa [#allocation9], 0 }
   0x9   :  { %19 = vsyncpa [#allocation4], 0 }
   0xa   :  { %21 = vsyncpa [#allocation4 + $0x1], 0  ;;  %s1801_s24 = smov 0   ;;  %s1803_s25 = smov 0  }
   0xb   :  { %s1805_s26 = smov 0   ;;  %s1807_s27 = smov 0  }
   0xc   :  { %s1809_s28 = smov 0   ;;  %s1811_s29 = smov 0  }
   0xd LB: > { %2207 = sst [smem:[#allocation16_spill]] %s1743_s28  ;;  %s1832_s30 = sadd.s32 4294967295, %s1747_s29   ;;  %s1747_s29 = sphi %s1811_s29, %s27_s29   ;;  %s1743_s28 = sphi %s1809_s28, %s2243_s28   ;;  %s1739_s27 = sphi %s1807_s27, %s2242_s27   ;;  %s1735_s26 = sphi %s1805_s26, %s2246_s26   ;;  %s1731_s25 = sphi %s1803_s25, %s2245_s25   ;;  %s1727_s24 = sphi %s1801_s24, %s2244_s24  }
   0xe   : > { %2208 = sst [smem:[#allocation17_spill]] %s1747_s29  ;;  %s1251_s8 = sadd.s32 4294967294, %s1747_s29  }
   0xf   : > { %p68_p0 = scmp.ne.s32.totalorder %s1731_s25, %s1727_s24  ;;  %p2185_p1 = scmp.eq.s32.totalorder %s1832_s30, 0 }
  0x10   : > { %p249_p3 = scmp.eq.s32.totalorder %s1251_s8, 1  ;;  %p1252_p5 = scmp.ge.s32.totalorder %s1747_s29, 1 }
  0x11   : > { %p1841_p4 = por %p2185_p1, %p68_p0  ;;  %p256_p7 = scmp.lt.s32.totalorder %s1747_s29, 3 }
  0x12   : > { %p1846_p6 = por %p249_p3, %p68_p0  ;;  %s1749_s12 = smov [#allocation8]  }
  0x13   : > { %s2209_s9 = scalar_select %p1841_p4, 1, 0 }
  0x14   : > { %s2210_s10 = scalar_select %p1846_p6, 1, 0 }
  0x15   : > { %p1851_p8 = pnand %p1252_p5, %p256_p7  ;;  %s268_s13 = sshll.u32 %s1749_s12, 4  ;;  %s269_s13 = int_to_ptr.vmem [resolvable:$true] %s268_s13 }
  0x16   : > { %2211 = sst [smem:[#allocation18_spill]] %s2210_s10  ;;  %s46_s15 = sadd.s32 1, %s1743_s28 }
  0x17   : > { %s2212_s11 = scalar_select %p1851_p8, 1, 0 }
  0x18   : > { %p1402_p9 = pneg %p1851_p8  ;;  %s2214_s4 = sld [smem:[#allocation22_spill]] }
  0x1a   : > { %p1860_p11 = pnand %p1402_p9, %p2185_p1 }
  0x1c   : > { %s2213_s14 = scalar_select %p1860_p11, 1, 0 }
  0x1d   : > { %p2196_p13 = pneg %p1860_p11 }
  0x1e   : > { %s1511_s18 = scalar_lea.hbm %s2214_s4, 256 }
  0x1f   : > { %p1512_p12 = scmp.ne.s32.totalorder %s2214_s4, %s1511_s18  ;;  %p1518_p5 = scmp.lt.u32.totalorder %s1511_s18, %s2214_s4 }
  0x21   : > { %p1514_p0 = pnand %p2196_p13, %p1512_p12 }
  0x23   : > { %p1515_p3 = pneg %p1514_p0 }
  0x25   : > { %p1520_p7 = pnand %p1518_p5, %p1515_p3 }
  0x27   : > { %1523 = shalt.err (!%p1520_p7)
}
  0x28   : > { %s1524_s23 = scalar_lea.vmem %s269_s13, 256  ;;  %p1532_p2 = scmp.lt.s32.totalorder %s269_s13, %s269_s13 }
  0x29   : > { %p1525_p9 = scmp.ne.s32.totalorder %s269_s13, %s1524_s23  ;;  %p1533_p6 = scmp.lt.s32.totalorder %s1524_s23, %s1524_s23 }
  0x2b   : > { %p1527_p10 = pnand %p1525_p9, %p2196_p13  ;;  %p1534_p4 = por %p1533_p6, %p1532_p2 }
  0x2d   : > { %p1528_p1 = pneg %p1527_p10 }
  0x2f   : > { %p1535_p8 = pnand %p1534_p4, %p1528_p1 }
  0x31   : > { %1538 = shalt.err (!%p1535_p8)
}
  0x32   : > { %s2188_s8 = smov 64   ;;  %s2189_s12 = smov 4  }
  0x33   : > { %1405 = dma.hbm_to_vmem [thread:$0]  (!%p1860_p11), %s2214_s4, 256, %s269_s13, [#allocation9], %s2188_s8, %s2188_s8, %s2189_s12  }
  0x34   : > { %p48_p1 = scmp.ge.s32.totalorder %s46_s15, 2  ;;  %s55_s18 = sadd.s32 1, %s1735_s26 }
  0x35   : > { %p62_p2 = scmp.ne.s32.totalorder %s1735_s26, %s1731_s25  ;;  %p63_p4 = scmp.eq.s32.totalorder %s1747_s29, 0 }
  0x36   : > { %s2248_s15 = smov (%p48_p1, %s46_s15), 0  ;;  %p2216_p8 = scmp.eq.s32.totalorder %s1832_s30, 1 }
  0x37   : > { %2215 = sst [smem:[#allocation19_spill]] %s2248_s15  ;;  %p64_p6 = por %p63_p4, %p62_p2 }
  0x38   : > { %p1898_p10 = por %p2216_p8, %p62_p2  ;;  %s50_s20 = ssub.s32 %s1743_s28, %s2248_s15 }
  0x39   : > { %p1425_p12 = scmp.lt.s32.totalorder %s1747_s29, 2  ;;  %p53_p0 = scmp.eq.s32.totalorder %s50_s20, 0 }
  0x3a   : > { %s2217_s19 = scalar_select %p1898_p10, 1, 0 }
  0x3b   : > { %s2190_s21 = sand.u32 1, %s1735_s26   ;;  %s1911_s22 = sshll.u32 %s1743_s28, 6 }
  0x3c   : > { %s1908_s13 = sshll.u32 %s2190_s21, 2  ;;  %p1916_p3 = pnand %p1425_p12, %p64_p6 }
  0x3d   : > { %s1914_s23 = scalar_select %p53_p0, %s1735_s26, %s55_s18  }
  0x3e   : > { %s2219_s16 = scalar_select %p1916_p3, 1, 0 }
  0x3f   : > { %2218 = sst [smem:[#allocation20_spill]] %s1914_s23  ;;  %s317_s17 = sand.u32 1, %s1747_s29  }
  0x40   : > { %s2220_s1 = sld [smem:[#allocation21_spill]]  ;;  %s321_s21 = scalar_lea.vmem [#allocation5], %s1908_s13 }
  0x41   : > { %s329_s4 = sshll.u32 %s321_s21, 4  ;;  %s1752_s18 = smov [#allocation10]   ;;  %s1928_s4 = int_to_ptr.vmem [resolvable:$true] %s329_s4 }
  0x42   : > { %s1930_s15 = sshll.u32 %s1752_s18, 4  ;;  %s1932_s28 = scalar_lea.sflag [#allocation6], %s317_s17  ;;  %s282_s15 = int_to_ptr.vmem [resolvable:$true] %s1930_s15 }
  0x43   : > { %p1938_p7 = pneg %p1916_p3 }
  0x45   : > { %s2221_s8 = scalar_select %p1938_p7, 1, 0 }
  0x46   : > { %s1925_s20 = scalar_lea.hbm %s2220_s1, %s1911_s22  ;;  %s1544_s29 = scalar_lea.hbm %s2220_s1, 128 }
  0x47   : > { %s1539_s23 = scalar_lea.hbm %s1925_s20, 64  ;;  %p1545_p2 = scmp.lt.u32.totalorder %s1925_s20, %s2220_s1 }
  0x48   : > { %p1540_p5 = scmp.ne.s32.totalorder %s1925_s20, %s1539_s23  ;;  %p1546_p4 = scmp.lt.u32.totalorder %s1544_s29, %s1539_s23 }
  0x49   : > { %p1548_p8 = scmp.lt.u32.totalorder %s1539_s23, %s1925_s20 }
  0x4a   : > { %p1542_p9 = pnand %p1938_p7, %p1540_p5  ;;  %p1547_p6 = por %p1546_p4, %p1545_p2 }
  0x4c   : > { %p1543_p1 = pneg %p1542_p9  ;;  %p1549_p12 = por %p1548_p8, %p1547_p6 }
  0x4e   : > { %p1550_p0 = pnand %p1549_p12, %p1543_p1 }
  0x50   : > { %1553 = shalt.err (!%p1550_p0)
}
  0x51   : > { %s1554_s17 = scalar_lea.vmem %s1928_s4, 64  ;;  %s1753_s12 = smov [#allocation5]  }
  0x52   : > { %p1555_p5 = scmp.ne.s32.totalorder %s1928_s4, %s1554_s17  ;;  %s1559_s21 = sshll.u32 %s1753_s12, 4  ;;  %s1560_s21 = int_to_ptr.vmem [resolvable:$false] %s1559_s21 }
  0x53   : > { %s1561_s10 = scalar_lea.vmem %s1560_s21, 128  ;;  %p1562_p10 = scmp.lt.s32.totalorder %s1928_s4, %s1560_s21 }
  0x54   : > { %p1557_p9 = pnand %p1555_p5, %p1938_p7  ;;  %p1563_p11 = scmp.lt.s32.totalorder %s1561_s10, %s1554_s17 }
  0x56   : > { %p1558_p13 = pneg %p1557_p9  ;;  %p1564_p2 = por %p1563_p11, %p1562_p10 }
  0x58   : > { %p1565_p4 = pnand %p1564_p2, %p1558_p13 }
  0x5a   : > { %1568 = shalt.err (!%p1565_p4)
}
  0x5b   : > { %1415 = dma.hbm_to_vmem [thread:$0]  (!%p1916_p3), %s1925_s20, 64, %s1928_s4, %s1932_s28  }
  0x5c   : > { %s2222_s5 = sld [smem:[#allocation23_spill]]  ;;  %p2223_p11 = scmp.ne.s32.totalorder %s2213_s14, 0 }
  0x5e   : > { %p2224_p13 = pneg %p2223_p11 }
  0x62   : > { %s1569_s18 = scalar_lea.hbm %s2222_s5, 1024 }
  0x63   : > { %p1570_p1 = scmp.ne.s32.totalorder %s2222_s5, %s1569_s18  ;;  %p1576_p8 = scmp.lt.u32.totalorder %s1569_s18, %s2222_s5 }
  0x65   : > { %p1572_p10 = pnand %p1570_p1, %p2224_p13 }
  0x67   : > { %p1573_p6 = pneg %p1572_p10 }
  0x69   : > { %p1578_p12 = pnand %p1576_p8, %p1573_p6 }
  0x6b   : > { %1581 = shalt.err (!%p1578_p12)
}
  0x6c   : > { %s1582_s4 = scalar_lea.vmem %s282_s15, 1024  ;;  %p2225_p5 = pmov %p2224_p13 }
  0x6d   : > { %p1583_p0 = scmp.ne.s32.totalorder %s282_s15, %s1582_s4  ;;  %p1590_p4 = scmp.lt.s32.totalorder %s282_s15, %s282_s15 }
  0x6e   : > { %p1591_p3 = scmp.lt.s32.totalorder %s1582_s4, %s1582_s4 }
  0x6f   : > { %p1585_p9 = pnand %p1583_p0, %p2225_p5 }
  0x70   : > { %p1592_p7 = por %p1591_p3, %p1590_p4 }
  0x71   : > { %p1586_p2 = pneg %p1585_p9 }
  0x73   : > { %p1593_p1 = pnand %p1592_p7, %p1586_p2 }
  0x75   : > { %1596 = shalt.err (!%p1593_p1)
}
  0x76   : > { %s2226_s1 = smov 4   ;;  %s2227_s20 = smov 64  }
  0x77   : > { %1408 = dma.hbm_to_vmem [thread:$0]  (!%p2223_p11), %s2222_s5, 1024, %s282_s15, [#allocation9], %s2227_s20, %s2227_s20, %s2226_s1  }
  0x78   : > { %s1990_s12 = scalar_lea.hbm %s2177_s0, %s1911_s22  ;;  %s302_s14 = scalar_lea.vmem [#allocation2], %s1908_s13 }
  0x79   : > { %s310_s17 = sshll.u32 %s302_s14, 4  ;;  %s1999_s10 = scalar_lea.hbm %s2179_s2, %s1911_s22  ;;  %s1993_s17 = int_to_ptr.vmem [resolvable:$true] %s310_s17 }
  0x7a   : > { %s2228_s29 = sand.u32 1, %s1735_s26   ;;  %s1597_s1 = scalar_lea.hbm %s1990_s12, 64 }
  0x7b   : > { %s299_s15 = scalar_lea.sflag [#allocation3], %s2228_s29  ;;  %p1598_p3 = scmp.ne.s32.totalorder %s1990_s12, %s1597_s1 }
  0x7c   : > { %p2229_p7 = scmp.ne.s32.totalorder %s2221_s8, 0  ;;  %s1602_s18 = scalar_lea.hbm %s2177_s0, 128 }
  0x7d   : > { %p1603_p10 = scmp.lt.u32.totalorder %s1990_s12, %s2177_s0  ;;  %p1604_p6 = scmp.lt.u32.totalorder %s1602_s18, %s1597_s1 }
  0x7e   : > { %p1600_p11 = pnand %p1598_p3, %p2229_p7  ;;  %p1606_p12 = scmp.lt.u32.totalorder %s1597_s1, %s1990_s12 }
  0x7f   : > { %p1605_p8 = por %p1604_p6, %p1603_p10 }
  0x80   : > { %p1601_p13 = pneg %p1600_p11 }
  0x81   : > { %p1607_p0 = por %p1606_p12, %p1605_p8 }
  0x83   : > { %p1608_p5 = pnand %p1607_p0, %p1601_p13 }
  0x85   : > { %1611 = shalt.err (!%p1608_p5)
}
  0x86   : > { %s1612_s22 = scalar_lea.vmem %s1993_s17, 64  ;;  %s1754_s21 = smov [#allocation2]  }
  0x87   : > { %p1613_p9 = scmp.ne.s32.totalorder %s1993_s17, %s1612_s22  ;;  %s1617_s4 = sshll.u32 %s1754_s21, 4  ;;  %s1618_s4 = int_to_ptr.vmem [resolvable:$false] %s1617_s4 }
  0x88   : > { %s1619_s5 = scalar_lea.vmem %s1618_s4, 128  ;;  %p1620_p1 = scmp.lt.s32.totalorder %s1993_s17, %s1618_s4 }
  0x89   : > { %p1615_p2 = pnand %p1613_p9, %p2229_p7  ;;  %p1621_p3 = scmp.lt.s32.totalorder %s1619_s5, %s1612_s22 }
  0x8b   : > { %p1616_p4 = pneg %p1615_p2  ;;  %p1622_p11 = por %p1621_p3, %p1620_p1 }
  0x8d   : > { %p1623_p10 = pnand %p1622_p11, %p1616_p4 }
  0x8f   : > { %1626 = shalt.err (!%p1623_p10)
}
  0x90   : > { %p2230_p13 = scmp.ne.s32.totalorder %s2219_s16, 0  ;;  %s340_s29 = scalar_lea.vmem [#allocation7], %s1908_s13 }
  0x91   : > { %s348_s1 = sshll.u32 %s340_s29, 4  ;;  %s1627_s20 = scalar_lea.hbm %s1999_s10, 64  ;;  %s349_s1 = int_to_ptr.vmem [resolvable:$true] %s348_s1 }
  0x92   : > { %1412 = dma.hbm_to_vmem [thread:$0]  (!%p2230_p13), %s1990_s12, 64, %s1993_s17, %s299_s15  }
  0x93   : > { %p1628_p6 = scmp.ne.s32.totalorder %s1999_s10, %s1627_s20  ;;  %s1632_s14 = scalar_lea.hbm %s2179_s2, 128 }
  0x94   : > { %p1633_p0 = scmp.lt.u32.totalorder %s1999_s10, %s2179_s2  ;;  %p1634_p5 = scmp.lt.u32.totalorder %s1632_s14, %s1627_s20 }
  0x95   : > { %p1630_p8 = pnand %p1628_p6, %p2229_p7  ;;  %p1636_p2 = scmp.lt.u32.totalorder %s1627_s20, %s1999_s10 }
  0x96   : > { %p1635_p9 = por %p1634_p5, %p1633_p0 }
  0x97   : > { %p1631_p12 = pneg %p1630_p8 }
  0x98   : > { %p1637_p4 = por %p1636_p2, %p1635_p9 }
  0x9a   : > { %p1638_p1 = pnand %p1637_p4, %p1631_p12 }
  0x9c   : > { %1641 = shalt.err (!%p1638_p1)
}
  0x9d   : > { %s1642_s13 = scalar_lea.vmem %s349_s1, 64  ;;  %s1755_s12 = smov [#allocation7]  }
  0x9e   : > { %p1643_p3 = scmp.ne.s32.totalorder %s349_s1, %s1642_s13  ;;  %s1647_s17 = sshll.u32 %s1755_s12, 4  ;;  %s1648_s17 = int_to_ptr.vmem [resolvable:$false] %s1647_s17 }
  0x9f   : > { %s1649_s15 = scalar_lea.vmem %s1648_s17, 128  ;;  %p1650_p6 = scmp.lt.s32.totalorder %s349_s1, %s1648_s17 }
  0xa0   : > { %p1645_p11 = pnand %p1643_p3, %p2229_p7  ;;  %p1651_p8 = scmp.lt.s32.totalorder %s1649_s15, %s1642_s13 }
  0xa2   : > { %p1646_p10 = pneg %p1645_p11  ;;  %p1652_p13 = por %p1651_p8, %p1650_p6 }
  0xa4   : > { %p1653_p0 = pnand %p1652_p13, %p1646_p10 }
  0xa6   : > { %1656 = shalt.err (!%p1653_p0)
}
  0xa7   : > { %p2231_p5 = scmp.ne.s32.totalorder %s2219_s16, 0  ;;  %p2232_p12 = scmp.ne.s32.totalorder %s2212_s11, 0 }
  0xa8   : > { %s2046_s8 = sand.u32 (!%p2232_p12), 1, %s1731_s25   ;;  %p2233_p7 = scmp.ne.s32.totalorder (!%p2232_p12), %s2209_s9, 0 }
  0xa9   : > { %1418 = dma.hbm_to_vmem [thread:$0]  (!%p2231_p5), %s1999_s10, 64, %s349_s1, %s1932_s28  }
  0xaa   : > { %367 = sbr.rel (%p2232_p12) target bundleno = 686 (0x2ae), region = 48  ;;  %s2049_s4 = sshll.u32 (!%p2232_p12), %s2046_s8, 2 }
  0xab   : > { %s370_s5 = scalar_lea.sflag (!%p2232_p12), [#allocation3], %s2046_s8  ;;  %s373_s29 = scalar_lea.vmem (!%p2232_p12), [#allocation2], %s2049_s4 }
  0xb1   : > { %1710 = dma.done.wait (%p2233_p7), %s370_s5, 64  }
  0xb2   : > { %1712 = vsyncadd (%p2233_p7), %s370_s5, 4294967232  ;;  %s378_s28 = sand.u32 1, %s1832_s30   ;;  %s382_s16 = scalar_lea.vmem [#allocation5], %s2049_s4 }
  0xb3   : > { %s379_s11 = scalar_lea.sflag [#allocation6], %s378_s28 }
  0xb4   : > { %1714 = dma.done.wait (%p2233_p7), %s379_s11, 128  }
  0xb5   : > { %1716 = vsyncadd (%p2233_p7), %s379_s11, 4294967168  ;;  %s391_s10 = scalar_lea.vmem [#allocation7], %s2049_s4  ;;  %p2234_p13 = scmp.eq.s32.totalorder %s1832_s30, 0 }
  0xb7   : > { %1718 = dma.done.wait (%p2234_p13), [#allocation9], 1280   ;;  %p2235_p9 = pmov %p2234_p13 }
  0xb8   : > { %v493_v0 = vlaneseq  ;;  %v1756_v1 = vmov 1966171168   ;;  %v1485_v6 = vld [vmem:[#allocation8] sm:$0xff]   ;;  %v1486_v7 = vld [vmem:[#allocation8 + $0x8] sm:$0xff]   ;;  %v1487_v12 = vld [vmem:[#allocation10] sm:$0xff]   ;;  %vm650_vm0 = vcmask 261120  }
  0xb9   : > { %1720 = vsyncadd (%p2235_p9), [#allocation9], 4294966016  ;;  %v491_v2 = vunpack.c.l.s4 %v1756_v1  ;;  %1350 = vmatprep.subr.bf16.mxu0 %v1485_v6  ;;  %v1270_v8 = vld.sshfl [vmem:[%s373_s29] sm:$0x33 pattern:$0x75316420]  ;;  %1362 = vmatprep.subr.bf16.mxu1 %v1487_v12 }
  0xba   : > { %v2068_v3 = vshrl.u32 %v493_v0, 7  ;;  %1351 = vmatpush3.bf16.msra.mxu0 %v1485_v6  ;;  %v489_v9 = vcombine.high %v1270_v8, %v1270_v8  ;;  %v1488_v13 = vld [vmem:[#allocation10 + $0x8] sm:$0xff]   ;;  %1363 = vmatpush3.bf16.msra.mxu1 %v1487_v12  ;;  %v456_v29 = vld [vmem:[%s382_s16] sm:$0xf]  ;;  %p447_p2 = scmp.lt.s32.totalorder %s1739_s27, 1  ;;  %s1268_s22 = sshll.u32 %s2046_s8, 5 }
  0xbb   : > { %v492_v4 = vunpack.c.0.s8 %v491_v2  ;;  %1352 = vmatprep.subr.bf16.mxu0 %v1486_v7  ;;  %1364 = vmatprep.subr.bf16.mxu1 %v1488_v13  ;;  %v1489_v2 = vld [vmem:[#allocation10 + $0x10] sm:$0xff]   ;;  %v1491_v6 = vld [vmem:[#allocation10 + $0x20] sm:$0xff]   ;;  %s446_s21 = scalar_lea.vmem [#allocation11], %s1268_s22  ;;  %s1308_s12 = sshll.u32 %s1739_s27, 9 }
  0xbc   : > { %v2075_v11 = vsub.s32 0, %v2068_v3  ;;  %s448_s30 = scalar_select %p447_p2, %s1739_s27, 1 }
  0xbd   : > { %v2071_v5 = vsub.s32 %v492_v4, %v2068_v3  ;;  %v1490_v4 = vld [vmem:[#allocation10 + $0x18] sm:$0xff]   ;;  %s1082_s13 = sshll.u32 %s446_s21, 4  ;;  %s2128_s4 = scalar_lea.hbm %s2184_s7, %s1308_s12  ;;  %s2123_s13 = int_to_ptr.vmem [resolvable:$true] %s1082_s13 }
  0xbe   : > { %1353 = vmatpush3.bf16.msra.mxu0 %v1486_v7  ;;  %1365 = vmatpush3.bf16.msra.mxu1 %v1488_v13  ;;  %v1492_v7 = vld [vmem:[#allocation10 + $0x28] sm:$0xff]   ;;  %v1757_v13 = vmov 286326784   ;;  %s1269_s9 = sshll.u32 %s448_s30, 2  ;;  %s1066_s27 = scalar_lea.sflag [#allocation4], %s2046_s8 }
  0xbf   : > { %v496_v10 = vrot.slane %v1270_v8, %v2071_v5  ;;  %v503_v14 = vrot.slane %v489_v9, %v2071_v5  ;;  %1366 = vmatprep.subr.bf16.mxu1 %v1489_v2  ;;  %v1493_v8 = vld [vmem:[#allocation10 + $0x30] sm:$0xff]   ;;  %v1494_v9 = vld [vmem:[#allocation10 + $0x38] sm:$0xff]   ;;  %s453_s23 = scalar_lea.vmem %s2180_s3, %s1269_s9  ;;  %s1657_s5 = scalar_lea.vmem %s2123_s13, 512 }
  0xc0   : > { %p1658_p4 = scmp.ne.s32.totalorder %s2123_s13, %s1657_s5  ;;  %p2236_p1 = scmp.ne.s32.totalorder %s2217_s19, 0 }
  0xc1   : > { %v507_v15 = vunpack.i.h.s16 %v496_v10  ;;  %v1271_v16 = vpack.i.b16 %v496_v10, %v496_v10  ;;  %v504_v17 = vcombine.high %v496_v10, %v496_v10  ;;  %v509_v20 = vunpack.i.h.s16 %v503_v14  ;;  %v1285_v10 = vld.sshfl [vmem:[%s391_s10] sm:$0x33 pattern:$0x75316420]  ;;  %s1758_s29 = smov [#allocation11]  }
  0xc2   : > { %v1272_v21 = vpack.i.b16 %v503_v14, %v503_v14  ;;  %v505_v24 = vcombine.high %v503_v14, %v503_v14  ;;  %1367 = vmatpush3.bf16.msra.mxu1 %v1489_v2  ;;  %v745_v12 = vcombine.high %v1285_v10, %v1285_v10  ;;  %v779_v14 = vunpack.c.l.s4 %v1757_v13  ;;  %p1659_p3 = pnand %p1658_p4, %p2236_p1  ;;  %s1661_s28 = sshll.u32 %s1758_s29, 4  ;;  %s1662_s28 = int_to_ptr.vmem [resolvable:$false] %s1661_s28 }
  0xc3   : > { %v515_v18 = vpack.i.b16 %v507_v15, %v507_v15  ;;  %v525_v19 = vrot.slane %v1271_v16, %v2075_v11  ;;  %v511_v22 = vunpack.i.h.s16 %v504_v17  ;;  %v1273_v23 = vpack.i.b16 %v504_v17, %v504_v17  ;;  %1368 = vmatprep.subr.bf16.mxu1 %v1490_v4  ;;  %s1663_s11 = scalar_lea.vmem %s1662_s28, 1024  ;;  %p1664_p10 = scmp.lt.s32.totalorder %s2123_s13, %s1662_s28 }
  0xc4   : > { %v517_v27 = vpack.i.b16 %v509_v20, %v509_v20  ;;  %v533_v28 = vrot.slane %v1272_v21, %v2075_v11  ;;  %v513_v32 = vunpack.i.h.s16 %v505_v24  ;;  %v1274_v33 = vpack.i.b16 %v505_v24, %v505_v24  ;;  %p1660_p11 = pneg %p1659_p3  ;;  %p1665_p6 = scmp.lt.s32.totalorder %s1663_s11, %s1657_s5 }
  0xc5   : > { %v529_v25 = vrot.slane %v515_v18, %v2075_v11  ;;  %v555_v26 = vpack.i.b16 %v525_v19, %v525_v19  ;;  %v519_v30 = vpack.i.b16 %v511_v22, %v511_v22  ;;  %v541_v31 = vrot.slane %v1273_v23, %v2075_v11 }
  0xc6   : > { %v537_v36 = vrot.slane %v517_v27, %v2075_v11  ;;  %v569_v37 = vpack.i.b16 %v533_v28, %v533_v28  ;;  %v521_v40 = vpack.i.b16 %v513_v32, %v513_v32  ;;  %v549_v41 = vrot.slane %v1274_v33, %v2075_v11  ;;  %1369 = vmatpush3.bf16.msra.mxu1 %v1490_v4  ;;  %p1666_p8 = por %p1665_p6, %p1664_p10 }
  0xc7   : > { %v560_v34 = vrot.slane %v555_v26, %v2075_v11  ;;  %v562_v35 = vpack.i.b16 %v529_v25, %v529_v25  ;;  %v545_v38 = vrot.slane %v519_v30, %v2075_v11  ;;  %v583_v39 = vpack.i.b16 %v541_v31, %v541_v31  ;;  %1370 = vmatprep.subr.bf16.mxu1 %v1491_v6  ;;  %v457_v30 = vld [vmem:[%s453_s23] sm:$0xf] }
  0xc8   : > { %v574_v44 = vrot.slane %v569_v37, %v2075_v11  ;;  %v576_v45 = vpack.i.b16 %v537_v36, %v537_v36  ;;  %v553_v48 = vrot.slane %v521_v40, %v2075_v11  ;;  %v597_v49 = vpack.i.b16 %v549_v41, %v549_v41  ;;  %p1667_p0 = pnand %p1666_p8, %p1660_p11 }
  0xc9   : > { %v567_v42 = vrot.slane %v562_v35, %v2075_v11  ;;  %v610_v43 = vmul.bf16 %v560_v34, %v456_v29  ;;  %v588_v46 = vrot.slane %v583_v39, %v2075_v11  ;;  %v590_v47 = vpack.i.b16 %v545_v38, %v545_v38 }
  0xca   : > { %v581_v51 = vrot.slane %v576_v45, %v2075_v11  ;;  %v612_v52 = vmul.bf16 %v574_v44, %v456_v29  ;;  %v604_v55 = vpack.i.b16 %v553_v48, %v553_v48  ;;  %v602_v58 = vrot.slane %v597_v49, %v2075_v11  ;;  %1371 = vmatpush3.bf16.msra.mxu1 %v1491_v6 }
  0xcb   : > { %v611_v50 = vmul.bf16 %v567_v42, %v456_v29  ;;  %v595_v53 = vrot.slane %v590_v47, %v2075_v11  ;;  %v614_v54 = vmul.bf16 %v588_v46, %v456_v29  ;;  %1372 = vmatprep.subr.bf16.mxu1 %v1492_v7  ;;  %v759_v15 = vrot.slane %v745_v12, %v2071_v5 }
  0xcc   : > { %v613_v57 = vmul.bf16 %v581_v51, %v456_v29  ;;  %v609_v60 = vrot.slane %v604_v55, %v2075_v11  ;;  %v616_v63 = vmul.bf16 %v602_v58, %v456_v29  ;;  %v752_v16 = vrot.slane %v1285_v10, %v2071_v5 }
  0xcd   : > { %v1275_v56 = vcombine.low %v610_v43, %v611_v50  ;;  %v615_v59 = vmul.bf16 %v595_v53, %v456_v29  ;;  %v780_v17 = vunpack.c.0.s8 %v779_v14  ;;  %v765_v18 = vunpack.i.h.s16 %v759_v15 }
  0xce   : > { %v1276_v61 = vcombine.low %v612_v52, %v613_v57  ;;  %v617_v0 = vmul.bf16 %v609_v60, %v456_v29  ;;  %1373 = vmatpush3.bf16.msra.mxu1 %v1492_v7  ;;  %v763_v19 = vunpack.i.h.s16 %v752_v16  ;;  %v1287_v21 = vpack.i.b16 %v759_v15, %v759_v15 }
  0xcf   : > { %1354 = vmatprep.mubr.msk.bf16.mxu0 %vm650_vm0, %v1275_v56  ;;  %v1277_v62 = vcombine.low %v614_v54, %v615_v59  ;;  %1374 = vmatprep.subr.bf16.mxu1 %v1493_v8  ;;  %v783_v20 = vsub.s32 %v780_v17, %v2068_v3  ;;  %v1286_v22 = vpack.i.b16 %v752_v16, %v752_v16  ;;  %v728_v36 = vunpack.c.l.bf16 %v457_v30 }
  0xd0   : > { %1355 = vmatmul.mubr.msk.bf16.vlgmr.msra.gmra.mrb[0].mxu0 %vm650_vm0, %v1276_v61  ;;  %v1278_v1 = vcombine.low %v616_v63, %v617_v0  ;;  %v773_v23 = vpack.i.b16 %v765_v18, %v765_v18  ;;  %v761_v24 = vcombine.high %v759_v15, %v759_v15  ;;  %v771_v25 = vpack.i.b16 %v763_v19, %v763_v19 }
  0xd1   : > { %1358 = vmatprep.mubr.msk.bf16.mxu0 %vm650_vm0, %v1277_v62  ;;  %v760_v26 = vcombine.high %v752_v16, %v752_v16  ;;  %v798_v27 = vrot.slane %v1287_v21, %v783_v20  ;;  %v784_v28 = vrot.slane %v1286_v22, %v783_v20 }
  0xd2   : > { %1375 = vmatpush3.bf16.msra.mxu1 %v1493_v8  ;;  %v805_v5 = vrot.slane %v773_v23, %v783_v20  ;;  %v769_v29 = vunpack.i.h.s16 %v761_v24  ;;  %v791_v31 = vrot.slane %v771_v25, %v783_v20  ;;  %v1289_v3 = vpack.i.b16 %v761_v24, %v761_v24 }
  0xd3   : > { %1376 = vmatprep.subr.bf16.mxu1 %v1494_v9  ;;  %v767_v32 = vunpack.i.h.s16 %v760_v26  ;;  %v844_v33 = vunpack.c.l.bf16 %v798_v27  ;;  %v842_v34 = vunpack.c.l.bf16 %v784_v28  ;;  %v1288_v35 = vpack.i.b16 %v760_v26, %v760_v26 }
  0xd4   : > { %v845_v37 = vunpack.c.l.bf16 %v805_v5  ;;  %v777_v38 = vpack.i.b16 %v769_v29, %v769_v29  ;;  %v843_v39 = vunpack.c.l.bf16 %v791_v31  ;;  %v826_v42 = vrot.slane %v1289_v3, %v783_v20 }
  0xd5   : > { %v775_v40 = vpack.i.b16 %v767_v32, %v767_v32  ;;  %v861_v41 = vrot.slane %v844_v33, %v2075_v11  ;;  %v853_v44 = vrot.slane %v842_v34, %v2075_v11  ;;  %v812_v45 = vrot.slane %v1288_v35, %v783_v20 }
  0xd6   : > { %1377 = vmatpush3.bf16.msra.mxu1 %v1494_v9  ;;  %v865_v48 = vrot.slane %v845_v37, %v2075_v11  ;;  %v833_v49 = vrot.slane %v777_v38, %v783_v20  ;;  %v857_v52 = vrot.slane %v843_v39, %v2075_v11  ;;  %v848_v57 = vunpack.c.l.bf16 %v826_v42  ;;  %v1290_v38 = vld [vmem:[%s2183_s6] ss:$0 sm:$0xff] }
  0xd7   : > { %v819_v53 = vrot.slane %v775_v40, %v783_v20  ;;  %v846_v60 = vunpack.c.l.bf16 %v812_v45 }
  0xd8   : > { %1359 = vmatmul.mubr.msk.bf16.gmra.mrb[4].mxu0 %vm650_vm0, %v1278_v1  ;;  %v849_v63 = vunpack.c.l.bf16 %v833_v49  ;;  %v877_v6 = vrot.slane %v848_v57, %v2075_v11 }
  0xd9   : > { %v847_v2 = vunpack.c.l.bf16 %v819_v53  ;;  %v869_v9 = vrot.slane %v846_v60, %v2075_v11 }
  0xda   : > { %v881_v13 = vrot.slane %v849_v63, %v2075_v11 }
  0xdb   : > { %v873_v16 = vrot.slane %v847_v2, %v2075_v11 }
 0x1a3   : > { %v1356_v43 = vpop.f32.mrb[0].mxu0 }
 0x1a4   : > { %v731_v46 = vadd.f32 %v1356_v43, %v728_v36  ;;  %v697_v47 = vpop.f32.mrb[1].mxu0 }
 0x1a5   : > { %v729_v50 = vadd.f32 %v728_v36, %v697_v47  ;;  %v1357_v51 = vpop.f32.mrb[2].mxu0 }
 0x1a6   : > { %v884_v54 = vadd.f32 %v861_v41, %v731_v46  ;;  %v732_v55 = vadd.f32 %v1357_v51, %v728_v36  ;;  %v700_v56 = vpop.f32.mrb[3].mxu0 }
 0x1a7   : > { %v882_v58 = vadd.f32 %v853_v44, %v729_v50  ;;  %v730_v59 = vadd.f32 %v728_v36, %v700_v56 }
 0x1a8   : > { %v892_v61 = vpack.c.bf16 %v884_v54, %v884_v54  ;;  %v885_v62 = vadd.f32 %v865_v48, %v732_v55 }
 0x1a9   : > { %v890_v0 = vpack.c.bf16 %v882_v58, %v882_v58  ;;  %v883_v1 = vadd.f32 %v857_v52, %v730_v59 }
 0x1aa   : > { %1495 = vtanh.bf16 %v892_v61  ;;  %v893_v4 = vpack.c.bf16 %v885_v62, %v885_v62 }
 0x1ab   : > { %1497 = vtanh.bf16 %v890_v0  ;;  %v891_v7 = vpack.c.bf16 %v883_v1, %v883_v1  ;;  %v1360_v8 = vpop.f32.mrb[4].mxu0 }
 0x1ac   : > { %1499 = vtanh.bf16 %v893_v4  ;;  %v735_v10 = vadd.f32 %v1360_v8, %v728_v36  ;;  %v713_v12 = vpop.f32.mrb[5].mxu0 }
 0x1ad   : > { %1501 = vtanh.bf16 %v891_v7  ;;  %v733_v14 = vadd.f32 %v728_v36, %v713_v12  ;;  %v1361_v15 = vpop.f32.mrb[6].mxu0 }
 0x1ae   : > { %v888_v17 = vadd.f32 %v877_v6, %v735_v10  ;;  %v736_v18 = vadd.f32 %v1361_v15, %v728_v36  ;;  %v716_v19 = vpop.f32.mrb[7].mxu0 }
 0x1af   : > { %v886_v20 = vadd.f32 %v869_v9, %v733_v14  ;;  %v734_v21 = vadd.f32 %v728_v36, %v716_v19 }
 0x1b0   : > { %v896_v22 = vpack.c.bf16 %v888_v17, %v888_v17  ;;  %v889_v23 = vadd.f32 %v881_v13, %v736_v18 }
 0x1b1   : > { %v894_v24 = vpack.c.bf16 %v886_v20, %v886_v20  ;;  %v887_v25 = vadd.f32 %v873_v16, %v734_v21 }
 0x1b2   : > { %1503 = vtanh.bf16 %v896_v22  ;;  %v897_v26 = vpack.c.bf16 %v889_v23, %v889_v23 }
 0x1b3   : > { %1505 = vtanh.bf16 %v894_v24  ;;  %v895_v27 = vpack.c.bf16 %v887_v25, %v887_v25 }
 0x1b4   : > { %1507 = vtanh.bf16 %v897_v26 }
 0x1b5   : > { %v1496_v28 = vpop.eup %1495  ;;  %1509 = vtanh.bf16 %v895_v27 }
 0x1b6   : > { %v1498_v5 = vpop.eup %1497 }
 0x1b7   : > { %v1500_v29 = vpop.eup %1499 }
 0x1b8   : > { %v1502_v30 = vpop.eup %1501  ;;  %v1292_v11 = vcombine.low %v1496_v28, %v1500_v29 }
 0x1b9   : > { %v1291_v31 = vcombine.low %v1498_v5, %v1502_v30 }
 0x1bb   : > { %1378 = vmatprep.mubr.bf16.mxu1 %v1291_v31 }
 0x1bc   : > { %1379 = vmatmul.mubr.bf16.vlgmr.msra.gmra.mrb[0].mxu1 %v1292_v11 }
 0x1bd   : > { %v1504_v32 = vpop.eup %1503 }
 0x1be   : > { %v1506_v33 = vpop.eup %1505 }
 0x1bf   : > { %v1508_v3 = vpop.eup %1507 }
 0x1c0   : > { %v1510_v34 = vpop.eup %1509  ;;  %v1294_v35 = vcombine.low %v1504_v32, %v1508_v3 }
 0x1c1   : > { %v1293_v36 = vcombine.low %v1506_v33, %v1510_v34 }
 0x1c3   : > { %1382 = vmatprep.mubr.bf16.mxu1 %v1293_v36 }
 0x1c4   : > { %1383 = vmatmul.mubr.bf16.gmra.mrb[4].mxu1 %v1294_v35 }
 0x28f   : > { %v1380_v37 = vpop.f32.mrb[0].mxu1 }
 0x290   : > { %v1018_v39 = vpop.f32.mrb[1].mxu1  ;;  %v1027_v41 = vadd.f32 %v1380_v37, %v1290_v38 }
 0x291   : > { %v1381_v40 = vpop.f32.mrb[2].mxu1  ;;  %v1019_v44 = vadd.f32 %v1290_v38, %v1018_v39 }
 0x292   : > { %v1030_v42 = vadd.f32 %v1381_v40, %v1290_v38  ;;  %v1021_v43 = vpop.f32.mrb[3].mxu1 }
 0x293   : > { %v1022_v45 = vadd.f32 %v1290_v38, %v1021_v43 }
 0x294   : > { %v1317_v46 = vpack.c.bf16 %v1030_v42, %v1027_v41 }
 0x295   : > { %v1312_v47 = vpack.c.bf16 %v1022_v45, %v1019_v44 }
 0x296   : > { %1329 = vst [vmem:[%s446_s21 + $0x8] sm:$0xff] %v1317_v46  }
 0x297   : > { %1313 = vst [vmem:[%s446_s21] sm:$0xff] %v1312_v47   ;;  %v1384_v48 = vpop.f32.mrb[4].mxu1 }
 0x298   : > { %v1034_v49 = vpop.f32.mrb[5].mxu1  ;;  %v1043_v51 = vadd.f32 %v1384_v48, %v1290_v38 }
 0x299   : > { %v1385_v50 = vpop.f32.mrb[6].mxu1  ;;  %v1035_v54 = vadd.f32 %v1290_v38, %v1034_v49 }
 0x29a   : > { %v1046_v52 = vadd.f32 %v1385_v50, %v1290_v38  ;;  %v1037_v53 = vpop.f32.mrb[7].mxu1 }
 0x29b   : > { %v1038_v55 = vadd.f32 %v1290_v38, %v1037_v53 }
 0x29c   : > { %v1327_v56 = vpack.c.bf16 %v1046_v52, %v1043_v51 }
 0x29d   : > { %v1322_v57 = vpack.c.bf16 %v1038_v55, %v1035_v54 }
 0x29e   : > { %1331 = vst [vmem:[%s446_s21 + $0x18] sm:$0xff] %v1327_v56  }
 0x29f   : > { %1330 = vst [vmem:[%s446_s21 + $0x10] sm:$0xff] %v1322_v57  }
 0x2a0   : > { %1670 = shalt.err (!%p1667_p0)
}
 0x2a1   : > { %s1671_s16 = scalar_lea.hbm %s2128_s4, 512  ;;  %s1675_s9 = scalar_lea.hbm %s2184_s7, 1024 }
 0x2a2   : > { %p1672_p5 = scmp.ne.s32.totalorder %s2128_s4, %s1671_s16  ;;  %p1676_p13 = scmp.lt.u32.totalorder %s2128_s4, %s2184_s7 }
 0x2a3   : > { %p1677_p9 = scmp.lt.u32.totalorder %s1675_s9, %s1671_s16  ;;  %p1679_p4 = scmp.lt.u32.totalorder %s1671_s16, %s2128_s4 }
 0x2a4   : > { %p1673_p12 = pnand %p1672_p5, %p2236_p1 }
 0x2a5   : > { %p1678_p2 = por %p1677_p9, %p1676_p13 }
 0x2a6   : > { %p1674_p7 = pneg %p1673_p12 }
 0x2a7   : > { %p1680_p3 = por %p1679_p4, %p1678_p2 }
 0x2a9   : > { %p1681_p11 = pnand %p1680_p3, %p1674_p7 }
 0x2ab   : > { %1684 = shalt.err (!%p1681_p11)
}
 0x2ac   : > { %s1759_s23 = smov 64   ;;  %s1760_s18 = smov 4  }
 0x2ad   : > { %1400 = dma.vmem_to_hbm [thread:$0]  (%p2236_p1), %s2123_s13, 512, %s2128_s4, %s1066_s27, %s1759_s23, %s1759_s23, %s1760_s18  }
 0x2ae PF: > { %s2237_s14 = sld [smem:[#allocation18_spill]]  ;;  %s2238_s22 = sld [smem:[#allocation17_spill]] }
 0x2af   : > { %s1097_s21 = sand.u32 1, %s1727_s24  }
 0x2b0   : > { %s1098_s12 = scalar_lea.sflag [#allocation4], %s1097_s21 }
 0x2b4   : > { %p2239_p10 = scmp.ne.s32.totalorder %s2237_s14, 0  ;;  %p2240_p6 = scmp.ge.s32.totalorder %s2238_s22, 2 }
 0x2b6   : > { %p1420_p8 = pnand %p2240_p6, %p2239_p10 }
 0x2b8   : > { %1722 = dma.done.wait (!%p1420_p8), %s1098_s12, 512  }
 0x2b9   : > { %1724 = vsyncadd (!%p1420_p8), %s1098_s12, 4294966784  ;;  %s27_s29 = sadd.s32 1, %s2238_s22   ;;  %s2241_s17 = sld [smem:[#allocation20_spill]] }
 0x2ba   : > { %p24_p0 = scmp.ge.s32.totalorder %s27_s29, 4   ;;  %s2242_s27 = sld [smem:[#allocation16_spill]] }
 0x2bb   : > { %s2243_s28 = sld [smem:[#allocation19_spill]]  ;;  %s2244_s24 = smov %s1731_s25 }
 0x2bc   : > { %s2245_s25 = smov %s1735_s26  ;;  %26 = sbr.rel (!%p24_p0) target bundleno = 13 (0xd), region = 128 }
 0x2bf   : > { %s2246_s26 = smov %s2241_s17 }
 0x2c3   :  { %1103 = vsyncpa [#allocation3], 1 }
 0x2c4   :  { %1105 = vsyncpa [#allocation3 + $0x1], 1 }
 0x2c5   :  { %1106 = vsyncpa [#allocation6], 1 }
 0x2c6   :  { %1108 = vsyncpa [#allocation6 + $0x1], 1 }
 0x2c7   :  { %1109 = vsyncpa [#allocation9], 1 }
 0x2c8   :  { %1110 = vsyncpa [#allocation4], 1 }
 0x2c9   :  { %1112 = vsyncpa [#allocation4 + $0x1], 1 }

</bundles_post_ra>
